<compile_context>
chip_gen: v7x
topology: tpu7x:2x2x1
jax: 0.10.0
libtpu: 0.0.40
codegen_flags: <defaults>
</compile_context>

<pallas_src>
import math
import jax
import jax.numpy as jnp
from jax.experimental import pallas as pl
from jax.experimental.pallas import tpu as pltpu


def _round_up(x, m):
    return ((x + m - 1) // m) * m


def _clsnet_kernel(x_ref, w1e_ref, w1o_ref, b1_ref, w2e_ref, w2o_ref, b2_ref,
                   fw1_ref, fb1_ref, fw2_ref, fb2_ref, o_ref):
    """Fused ClsNet forward for one batch tile of TB images.

    x_ref   : (28, TB, 28) bf16   raw pixels, rows = (image row, batch)
    w1e/w1o : (5, 28, 120) bf16   conv1 band weights (even / odd out column)
    b1_ref  : (1, 120)     f32    conv1 bias tiled over the 12 column pairs
    w2e/w2o : (5, 120, 80) bf16   conv2 band weights (even / odd out column)
    b2_ref  : (1, 80)      f32    conv2 bias tiled over the 4 column pairs
    fw1_ref : (4, 80, 50)  bf16   fc1 weight, torch CHW flatten folded in
    fb1_ref : (1, 50)      f32
    fw2_ref : (50, 10)     bf16
    fb2_ref : (1, 10)      f32
    o_ref   : (TB, 10)     f32    log-probabilities
    """
    f32 = jnp.float32
    TB = o_ref.shape[0]

    img = x_ref[...]                                        # (28, TB, 28) bf16

    # ---- conv1 (1->10, k5, valid): 5 banded matmuls per column parity ----
    # output rows = (i, b); lanes = (j//2)*10 + c  (j parity split over e/o)
    a1e = None
    a1o = None
    for kh in range(5):
        lhs = img[kh:kh + 24].reshape(24 * TB, 28)          # bf16, K=28
        de = jnp.dot(lhs, w1e_ref[kh], preferred_element_type=f32)
        do = jnp.dot(lhs, w1o_ref[kh], preferred_element_type=f32)
        a1e = de if a1e is None else a1e + de
        a1o = do if a1o is None else a1o + do

    # 2x2 max-pool (bias after max is exact: bias is constant per channel)
    c1 = jnp.maximum(a1e, a1o)                              # col pool (24TB,120)
    c1 = jnp.max(c1.reshape(12, 2, TB, 120), axis=1)        # row pool (12,TB,120)
    h1 = jnp.maximum(c1 + b1_ref[...], 0.0).astype(jnp.bfloat16)

    # ---- conv2 (10->20, k5, valid): 5 banded K=120 matmuls per parity ----
    a2e = None
    a2o = None
    for kh in range(5):
        lhs = h1[kh:kh + 8].reshape(8 * TB, 120)            # bf16, K=120
        de = jnp.dot(lhs, w2e_ref[kh], preferred_element_type=f32)
        do = jnp.dot(lhs, w2o_ref[kh], preferred_element_type=f32)
        a2e = de if a2e is None else a2e + de
        a2o = do if a2o is None else a2o + do
    # TODO(synk): nn.Dropout2d / F.dropout training-mode randomness not
    # reproduced; identity in inference (eval) mode.

    c2 = jnp.maximum(a2e, a2o)                              # (8TB, 80)
    c2 = jnp.max(c2.reshape(4, 2, TB, 80), axis=1)          # (4, TB, 80)
    h2 = jnp.maximum(c2 + b2_ref[...], 0.0).astype(jnp.bfloat16)

    # ---- fc1 + ReLU (torch's x.view(-1, 320) CHW flatten folded into fw1) ----
    accf = None
    for r in range(4):
        d = jnp.dot(h2[r], fw1_ref[r], preferred_element_type=f32)  # (TB, 50)
        accf = d if accf is None else accf + d
    hid = jnp.maximum(accf + fb1_ref[...], 0.0).astype(jnp.bfloat16)

    # ---- fc2 + log_softmax (dim=1) ----
    y = jnp.dot(hid, fw2_ref[...], preferred_element_type=f32) + fb2_ref[...]
    m = jnp.max(y, axis=-1, keepdims=True)
    lse = jnp.log(jnp.sum(jnp.exp(y - m), axis=-1, keepdims=True)) + m
    o_ref[...] = y - lse


def _conv1_band_weights(w1):
    """w1: (5, 5, 10) (kh, kw, cout) -> even/odd band weights (5, 28, 120).

    wbe[kh, x, n*10 + c] = w1[kh, x - 2n,     c]  (0 <= x - 2n     < 5)
    wbo[kh, x, n*10 + c] = w1[kh, x - (2n+1), c]  (0 <= x - (2n+1) < 5)
    so that dot(img_row_slice, wb*) produces conv1 output columns j = 2n (+1).
    """
    wbe = jnp.zeros((5, 28, 120), jnp.float32)
    wbo = jnp.zeros((5, 28, 120), jnp.float32)
    w1f = w1.astype(jnp.float32)
    for n in range(12):
        je, jo = 2 * n, 2 * n + 1
        wbe = wbe.at[:, je:je + 5, n * 10:(n + 1) * 10].set(w1f)
        wbo = wbo.at[:, jo:jo + 5, n * 10:(n + 1) * 10].set(w1f)
    return wbe.astype(jnp.bfloat16), wbo.astype(jnp.bfloat16)


def _conv2_band_weights(w2):
    """w2: (5, 5, 10, 20) HWIO -> even/odd band weights (5, 120, 80).

    wbe[kh, n*10 + c, m*20 + oc] = w2[kh, n - 2m,     c, oc]
    wbo[kh, n*10 + c, m*20 + oc] = w2[kh, n - (2m+1), c, oc]
    """
    wbe = jnp.zeros((5, 120, 80), jnp.float32)
    wbo = jnp.zeros((5, 120, 80), jnp.float32)
    w2f = w2.astype(jnp.float32)
    for m in range(4):
        for kw in range(5):
            ne = 2 * m + kw
            no = 2 * m + 1 + kw
            wbe = wbe.at[:, ne * 10:(ne + 1) * 10, m * 20:(m + 1) * 20].set(w2f[:, kw])
            wbo = wbo.at[:, no * 10:(no + 1) * 10, m * 20:(m + 1) * 20].set(w2f[:, kw])
    return wbe.astype(jnp.bfloat16), wbo.astype(jnp.bfloat16)


def clsnet_forward(x_nchw, params, tile_b=128):
    """x_nchw: (B, 1, 28, 28) float32 -> (B, 10) log-probabilities."""
    B = x_nchw.shape[0]
    TB = min(_round_up(B, 8), _round_up(tile_b, 8))
    Bp = _round_up(B, TB)

    # Raw pixels only; transpose so rows = (image row, batch) -> batch lands in
    # the sublane dim, kernel reshapes (24, TB, 28) -> (24*TB, 28) for free.
    img = x_nchw[:, 0, :, :].astype(jnp.float32)            # (B, 28, 28)
    x_t = jnp.transpose(img, (1, 0, 2))                     # (28, B, 28)
    if Bp != B:
        x_t = jnp.pad(x_t, ((0, 0), (0, Bp - B), (0, 0)))
    x_t = x_t.astype(jnp.bfloat16)

    w1e, w1o = _conv1_band_weights(params["conv1_w"][:, :, 0, :])
    b1l = jnp.tile(params["conv1_b"].astype(jnp.float32), (1, 12))    # (1, 120)
    w2e, w2o = _conv2_band_weights(params["conv2_w"])
    b2l = jnp.tile(params["conv2_b"].astype(jnp.float32), (1, 4))     # (1, 80)
    # fold torch's CHW flatten (index c*16 + h*4 + w) into fc1's weight layout
    fw1 = (params["fc1_w"].reshape(20, 4, 4, 50).transpose(1, 2, 0, 3)
           .reshape(4, 80, 50).astype(jnp.bfloat16))
    fb1 = params["fc1_b"].astype(jnp.float32)
    fw2 = params["fc2_w"].astype(jnp.bfloat16)
    fb2 = params["fc2_b"].astype(jnp.float32)

    out = pl.pallas_call(
        _clsnet_kernel,
        out_shape=jax.ShapeDtypeStruct((Bp, 10), jnp.float32),
        grid=(Bp // TB,),
        in_specs=[
            pl.BlockSpec((28, TB, 28), lambda i: (0, i, 0)),
            pl.BlockSpec((5, 28, 120), lambda i: (0, 0, 0)),
            pl.BlockSpec((5, 28, 120), lambda i: (0, 0, 0)),
            pl.BlockSpec((1, 120), lambda i: (0, 0)),
            pl.BlockSpec((5, 120, 80), lambda i: (0, 0, 0)),
            pl.BlockSpec((5, 120, 80), lambda i: (0, 0, 0)),
            pl.BlockSpec((1, 80), lambda i: (0, 0)),
            pl.BlockSpec((4, 80, 50), lambda i: (0, 0, 0)),
            pl.BlockSpec((1, 50), lambda i: (0, 0)),
            pl.BlockSpec((50, 10), lambda i: (0, 0)),
            pl.BlockSpec((1, 10), lambda i: (0, 0)),
        ],
        out_specs=pl.BlockSpec((TB, 10), lambda i: (i, 0)),
        compiler_params=pltpu.CompilerParams(
            dimension_semantics=("parallel",),
            vmem_limit_bytes=48 * 1024 * 1024),
    )(x_t, w1e, w1o, b1l, w2e, w2o, b2l, fw1, fb1, fw2, fb2)
    return out[:B]


def init_params(key):
    """Deterministic synthetic parameters (PyTorch-default-style uniform init).

    conv weights are HWIO; fc weights are (in, out) with fc1 rows in CHW order
    (matching torch's x.view(-1, 320)).
    """
    ks = jax.random.split(key, 8)

    def u(k, shape, fan_in):
        bound = 1.0 / math.sqrt(fan_in)
        return jax.random.uniform(k, shape, jnp.float32, -bound, bound)

    return {
        "conv1_w": u(ks[0], (5, 5, 1, 10), 1 * 5 * 5),
        "conv1_b": u(ks[1], (1, 10), 1 * 5 * 5),
        "conv2_w": u(ks[2], (5, 5, 10, 20), 10 * 5 * 5),
        "conv2_b": u(ks[3], (1, 20), 10 * 5 * 5),
        "fc1_w": u(ks[4], (320, 50), 320),
        "fc1_b": u(ks[5], (1, 50), 320),
        "fc2_w": u(ks[6], (50, 10), 50),
        "fc2_b": u(ks[7], (1, 10), 50),
    }


def _reference_forward(x_nchw, params):
    """Pure-JAX (XLA, f32 HIGHEST) reference mirroring the PyTorch module in eval mode."""
    hi = jax.lax.Precision.HIGHEST
    dn = ("NHWC", "HWIO", "NHWC")

    def pool2x2(v):
        b, h, w, c = v.shape
        return jnp.max(v.reshape(b, h // 2, 2, w // 2, 2, c), axis=(2, 4))

    x = jnp.transpose(x_nchw, (0, 2, 3, 1)).astype(jnp.float32)
    y = jax.lax.conv_general_dilated(x, params["conv1_w"], (1, 1), "VALID",
                                     dimension_numbers=dn, precision=hi)
    y = jnp.maximum(pool2x2(y + params["conv1_b"][0]), 0.0)
    y = jax.lax.conv_general_dilated(y, params["conv2_w"], (1, 1), "VALID",
                                     dimension_numbers=dn, precision=hi)
    y = jnp.maximum(pool2x2(y + params["conv2_b"][0]), 0.0)
    feats = jnp.transpose(y, (0, 3, 1, 2)).reshape(x.shape[0], 320)
    h = jnp.maximum(jnp.dot(feats, params["fc1_w"], precision=hi)
                    + params["fc1_b"], 0.0)
    logits = jnp.dot(h, params["fc2_w"], precision=hi) + params["fc2_b"]
    return jax.nn.log_softmax(logits, axis=-1)


if __name__ == "__main__":
    key = jax.random.PRNGKey(0)
    kx, kp = jax.random.split(key)
    # MNIST-like input implied by fc1's 320 = 20*4*4: (B, 1, 28, 28)
    x = jax.random.normal(kx, (2, 1, 28, 28), jnp.float32)
    params = init_params(kp)

    out = jax.jit(clsnet_forward)(x, params)
    out = jax.block_until_ready(out)
    assert out.shape == (2, 10)

    ref = _reference_forward(x, params)
    # bf16 MXU operands vs the f32-HIGHEST reference -> slightly looser tolerance
    assert jnp.allclose(out, ref, atol=2e-2, rtol=2e-2), (
        "mismatch vs reference, max abs err = "
        f"{jnp.max(jnp.abs(out - ref))}")
    print("KERNEL_OK")
</pallas_src>

<mosaic_0001>
module attributes {stable_mosaic.version = 11 : i64} {
  func.func @_clsnet_kernel(%arg0: i32, %arg1: memref<28x8x28xbf16, #tpu.memory_space<vmem>>, %arg2: memref<5x28x120xbf16, #tpu.memory_space<vmem>>, %arg3: memref<5x28x120xbf16, #tpu.memory_space<vmem>>, %arg4: memref<1x120xf32, #tpu.memory_space<vmem>>, %arg5: memref<5x120x80xbf16, #tpu.memory_space<vmem>>, %arg6: memref<5x120x80xbf16, #tpu.memory_space<vmem>>, %arg7: memref<1x80xf32, #tpu.memory_space<vmem>>, %arg8: memref<4x80x50xbf16, #tpu.memory_space<vmem>>, %arg9: memref<1x50xf32, #tpu.memory_space<vmem>>, %arg10: memref<50x10xbf16, #tpu.memory_space<vmem>>, %arg11: memref<1x10xf32, #tpu.memory_space<vmem>>, %arg12: memref<8x10xf32, #tpu.memory_space<vmem>>) attributes {dimension_semantics = [#tpu.dimension_semantics<parallel>], iteration_bounds = array<i64: 1>, scalar_prefetch = 0 : i64, scratch_operands = 0 : i64, tpu.core_type = #tpu.core_type<tc>, window_params = [{transform_indices = @transform_0, window_bounds = array<i64: 28, 8, 28>}, {pipeline_mode = #tpu.pipeline_mode<synchronous>, transform_indices = @transform_1, window_bounds = array<i64: 5, 28, 120>}, {pipeline_mode = #tpu.pipeline_mode<synchronous>, transform_indices = @transform_2, window_bounds = array<i64: 5, 28, 120>}, {pipeline_mode = #tpu.pipeline_mode<synchronous>, transform_indices = @transform_3, window_bounds = array<i64: 1, 120>}, {pipeline_mode = #tpu.pipeline_mode<synchronous>, transform_indices = @transform_4, window_bounds = array<i64: 5, 120, 80>}, {pipeline_mode = #tpu.pipeline_mode<synchronous>, transform_indices = @transform_5, window_bounds = array<i64: 5, 120, 80>}, {pipeline_mode = #tpu.pipeline_mode<synchronous>, transform_indices = @transform_6, window_bounds = array<i64: 1, 80>}, {pipeline_mode = #tpu.pipeline_mode<synchronous>, transform_indices = @transform_7, window_bounds = array<i64: 4, 80, 50>}, {pipeline_mode = #tpu.pipeline_mode<synchronous>, transform_indices = @transform_8, window_bounds = array<i64: 1, 50>}, {pipeline_mode = #tpu.pipeline_mode<synchronous>, transform_indices = @transform_9, window_bounds = array<i64: 50, 10>}, {pipeline_mode = #tpu.pipeline_mode<synchronous>, transform_indices = @transform_10, window_bounds = array<i64: 1, 10>}, {transform_indices = @transform_11, window_bounds = array<i64: 8, 10>}]} {
    %c0 = arith.constant 0 : index
    %c0_0 = arith.constant 0 : index
    %c0_1 = arith.constant 0 : index
    %0 = vector.load %arg1[%c0, %c0_0, %c0_1] : memref<28x8x28xbf16, #tpu.memory_space<vmem>>, vector<28x8x28xbf16>
    %1 = vector.extract_strided_slice %0 {offsets = [0, 0, 0], sizes = [24, 8, 28], strides = [1, 1, 1]} : vector<28x8x28xbf16> to vector<24x8x28xbf16>
    %2 = vector.shape_cast %1 : vector<24x8x28xbf16> to vector<192x28xbf16>
    %c0_2 = arith.constant 0 : index
    %c0_3 = arith.constant 0 : index
    %c0_4 = arith.constant 0 : index
    %3 = vector.load %arg2[%c0_2, %c0_3, %c0_4] : memref<5x28x120xbf16, #tpu.memory_space<vmem>>, vector<1x28x120xbf16>
    %4 = vector.shape_cast %3 : vector<1x28x120xbf16> to vector<28x120xbf16>
    %cst = arith.constant dense<0.000000e+00> : vector<192x120xf32>
    %5 = tpu.matmul %2, %4, %cst {dimension_numbers = #tpu.dot_dimension_numbers<[1], [0], [0], [1], [0, 0, 1, 1], [], []>} : vector<192x28xbf16>, vector<28x120xbf16>, vector<192x120xf32> -> vector<192x120xf32>
    %c0_5 = arith.constant 0 : index
    %c0_6 = arith.constant 0 : index
    %c0_7 = arith.constant 0 : index
    %6 = vector.load %arg3[%c0_5, %c0_6, %c0_7] : memref<5x28x120xbf16, #tpu.memory_space<vmem>>, vector<1x28x120xbf16>
    %7 = vector.shape_cast %6 : vector<1x28x120xbf16> to vector<28x120xbf16>
    %cst_8 = arith.constant dense<0.000000e+00> : vector<192x120xf32>
    %8 = tpu.matmul %2, %7, %cst_8 {dimension_numbers = #tpu.dot_dimension_numbers<[1], [0], [0], [1], [0, 0, 1, 1], [], []>} : vector<192x28xbf16>, vector<28x120xbf16>, vector<192x120xf32> -> vector<192x120xf32>
    %9 = vector.extract_strided_slice %0 {offsets = [1, 0, 0], sizes = [24, 8, 28], strides = [1, 1, 1]} : vector<28x8x28xbf16> to vector<24x8x28xbf16>
    %10 = vector.shape_cast %9 : vector<24x8x28xbf16> to vector<192x28xbf16>
    %c1 = arith.constant 1 : index
    %c0_9 = arith.constant 0 : index
    %c0_10 = arith.constant 0 : index
    %11 = vector.load %arg2[%c1, %c0_9, %c0_10] : memref<5x28x120xbf16, #tpu.memory_space<vmem>>, vector<1x28x120xbf16>
    %12 = vector.shape_cast %11 : vector<1x28x120xbf16> to vector<28x120xbf16>
    %cst_11 = arith.constant dense<0.000000e+00> : vector<192x120xf32>
    %13 = tpu.matmul %10, %12, %cst_11 {dimension_numbers = #tpu.dot_dimension_numbers<[1], [0], [0], [1], [0, 0, 1, 1], [], []>} : vector<192x28xbf16>, vector<28x120xbf16>, vector<192x120xf32> -> vector<192x120xf32>
    %c1_12 = arith.constant 1 : index
    %c0_13 = arith.constant 0 : index
    %c0_14 = arith.constant 0 : index
    %14 = vector.load %arg3[%c1_12, %c0_13, %c0_14] : memref<5x28x120xbf16, #tpu.memory_space<vmem>>, vector<1x28x120xbf16>
    %15 = vector.shape_cast %14 : vector<1x28x120xbf16> to vector<28x120xbf16>
    %cst_15 = arith.constant dense<0.000000e+00> : vector<192x120xf32>
    %16 = tpu.matmul %10, %15, %cst_15 {dimension_numbers = #tpu.dot_dimension_numbers<[1], [0], [0], [1], [0, 0, 1, 1], [], []>} : vector<192x28xbf16>, vector<28x120xbf16>, vector<192x120xf32> -> vector<192x120xf32>
    %17 = arith.addf %5, %13 : vector<192x120xf32>
    %18 = arith.addf %8, %16 : vector<192x120xf32>
    %19 = vector.extract_strided_slice %0 {offsets = [2, 0, 0], sizes = [24, 8, 28], strides = [1, 1, 1]} : vector<28x8x28xbf16> to vector<24x8x28xbf16>
    %20 = vector.shape_cast %19 : vector<24x8x28xbf16> to vector<192x28xbf16>
    %c2 = arith.constant 2 : index
    %c0_16 = arith.constant 0 : index
    %c0_17 = arith.constant 0 : index
    %21 = vector.load %arg2[%c2, %c0_16, %c0_17] : memref<5x28x120xbf16, #tpu.memory_space<vmem>>, vector<1x28x120xbf16>
    %22 = vector.shape_cast %21 : vector<1x28x120xbf16> to vector<28x120xbf16>
    %cst_18 = arith.constant dense<0.000000e+00> : vector<192x120xf32>
    %23 = tpu.matmul %20, %22, %cst_18 {dimension_numbers = #tpu.dot_dimension_numbers<[1], [0], [0], [1], [0, 0, 1, 1], [], []>} : vector<192x28xbf16>, vector<28x120xbf16>, vector<192x120xf32> -> vector<192x120xf32>
    %c2_19 = arith.constant 2 : index
    %c0_20 = arith.constant 0 : index
    %c0_21 = arith.constant 0 : index
    %24 = vector.load %arg3[%c2_19, %c0_20, %c0_21] : memref<5x28x120xbf16, #tpu.memory_space<vmem>>, vector<1x28x120xbf16>
    %25 = vector.shape_cast %24 : vector<1x28x120xbf16> to vector<28x120xbf16>
    %cst_22 = arith.constant dense<0.000000e+00> : vector<192x120xf32>
    %26 = tpu.matmul %20, %25, %cst_22 {dimension_numbers = #tpu.dot_dimension_numbers<[1], [0], [0], [1], [0, 0, 1, 1], [], []>} : vector<192x28xbf16>, vector<28x120xbf16>, vector<192x120xf32> -> vector<192x120xf32>
    %27 = arith.addf %17, %23 : vector<192x120xf32>
    %28 = arith.addf %18, %26 : vector<192x120xf32>
    %29 = vector.extract_strided_slice %0 {offsets = [3, 0, 0], sizes = [24, 8, 28], strides = [1, 1, 1]} : vector<28x8x28xbf16> to vector<24x8x28xbf16>
    %30 = vector.shape_cast %29 : vector<24x8x28xbf16> to vector<192x28xbf16>
    %c3 = arith.constant 3 : index
    %c0_23 = arith.constant 0 : index
    %c0_24 = arith.constant 0 : index
    %31 = vector.load %arg2[%c3, %c0_23, %c0_24] : memref<5x28x120xbf16, #tpu.memory_space<vmem>>, vector<1x28x120xbf16>
    %32 = vector.shape_cast %31 : vector<1x28x120xbf16> to vector<28x120xbf16>
    %cst_25 = arith.constant dense<0.000000e+00> : vector<192x120xf32>
    %33 = tpu.matmul %30, %32, %cst_25 {dimension_numbers = #tpu.dot_dimension_numbers<[1], [0], [0], [1], [0, 0, 1, 1], [], []>} : vector<192x28xbf16>, vector<28x120xbf16>, vector<192x120xf32> -> vector<192x120xf32>
    %c3_26 = arith.constant 3 : index
    %c0_27 = arith.constant 0 : index
    %c0_28 = arith.constant 0 : index
    %34 = vector.load %arg3[%c3_26, %c0_27, %c0_28] : memref<5x28x120xbf16, #tpu.memory_space<vmem>>, vector<1x28x120xbf16>
    %35 = vector.shape_cast %34 : vector<1x28x120xbf16> to vector<28x120xbf16>
    %cst_29 = arith.constant dense<0.000000e+00> : vector<192x120xf32>
    %36 = tpu.matmul %30, %35, %cst_29 {dimension_numbers = #tpu.dot_dimension_numbers<[1], [0], [0], [1], [0, 0, 1, 1], [], []>} : vector<192x28xbf16>, vector<28x120xbf16>, vector<192x120xf32> -> vector<192x120xf32>
    %37 = arith.addf %27, %33 : vector<192x120xf32>
    %38 = arith.addf %28, %36 : vector<192x120xf32>
    %39 = vector.extract_strided_slice %0 {offsets = [4, 0, 0], sizes = [24, 8, 28], strides = [1, 1, 1]} : vector<28x8x28xbf16> to vector<24x8x28xbf16>
    %40 = vector.shape_cast %39 : vector<24x8x28xbf16> to vector<192x28xbf16>
    %c4 = arith.constant 4 : index
    %c0_30 = arith.constant 0 : index
    %c0_31 = arith.constant 0 : index
    %41 = vector.load %arg2[%c4, %c0_30, %c0_31] : memref<5x28x120xbf16, #tpu.memory_space<vmem>>, vector<1x28x120xbf16>
    %42 = vector.shape_cast %41 : vector<1x28x120xbf16> to vector<28x120xbf16>
    %cst_32 = arith.constant dense<0.000000e+00> : vector<192x120xf32>
    %43 = tpu.matmul %40, %42, %cst_32 {dimension_numbers = #tpu.dot_dimension_numbers<[1], [0], [0], [1], [0, 0, 1, 1], [], []>} : vector<192x28xbf16>, vector<28x120xbf16>, vector<192x120xf32> -> vector<192x120xf32>
    %c4_33 = arith.constant 4 : index
    %c0_34 = arith.constant 0 : index
    %c0_35 = arith.constant 0 : index
    %44 = vector.load %arg3[%c4_33, %c0_34, %c0_35] : memref<5x28x120xbf16, #tpu.memory_space<vmem>>, vector<1x28x120xbf16>
    %45 = vector.shape_cast %44 : vector<1x28x120xbf16> to vector<28x120xbf16>
    %cst_36 = arith.constant dense<0.000000e+00> : vector<192x120xf32>
    %46 = tpu.matmul %40, %45, %cst_36 {dimension_numbers = #tpu.dot_dimension_numbers<[1], [0], [0], [1], [0, 0, 1, 1], [], []>} : vector<192x28xbf16>, vector<28x120xbf16>, vector<192x120xf32> -> vector<192x120xf32>
    %47 = arith.addf %37, %43 : vector<192x120xf32>
    %48 = arith.addf %38, %46 : vector<192x120xf32>
    %49 = arith.maximumf %47, %48 : vector<192x120xf32>
    %50 = vector.shape_cast %49 : vector<192x120xf32> to vector<12x2x8x120xf32>
    %cst_37 = arith.constant dense<0xFF800000> : vector<12x8x120xf32>
    %51 = vector.multi_reduction <maximumf>, %50, %cst_37 [1] : vector<12x2x8x120xf32> to vector<12x8x120xf32>
    %c0_38 = arith.constant 0 : index
    %c0_39 = arith.constant 0 : index
    %52 = vector.load %arg4[%c0_38, %c0_39] : memref<1x120xf32, #tpu.memory_space<vmem>>, vector<1x120xf32>
    %53 = vector.shape_cast %52 : vector<1x120xf32> to vector<1x1x120xf32>
    %54 = vector.broadcast %53 : vector<1x1x120xf32> to vector<12x8x120xf32>
    %55 = arith.addf %51, %54 : vector<12x8x120xf32>
    %cst_40 = arith.constant 0.000000e+00 : f32
    %56 = vector.broadcast %cst_40 : f32 to vector<12x8x120xf32>
    %57 = arith.maximumf %55, %56 : vector<12x8x120xf32>
    %58 = arith.truncf %57 : vector<12x8x120xf32> to vector<12x8x120xbf16>
    %59 = vector.extract_strided_slice %58 {offsets = [0, 0, 0], sizes = [8, 8, 120], strides = [1, 1, 1]} : vector<12x8x120xbf16> to vector<8x8x120xbf16>
    %60 = vector.shape_cast %59 : vector<8x8x120xbf16> to vector<64x120xbf16>
    %c0_41 = arith.constant 0 : index
    %c0_42 = arith.constant 0 : index
    %c0_43 = arith.constant 0 : index
    %61 = vector.load %arg5[%c0_41, %c0_42, %c0_43] : memref<5x120x80xbf16, #tpu.memory_space<vmem>>, vector<1x120x80xbf16>
    %62 = vector.shape_cast %61 : vector<1x120x80xbf16> to vector<120x80xbf16>
    %cst_44 = arith.constant dense<0.000000e+00> : vector<64x80xf32>
    %63 = tpu.matmul %60, %62, %cst_44 {dimension_numbers = #tpu.dot_dimension_numbers<[1], [0], [0], [1], [0, 0, 1, 1], [], []>} : vector<64x120xbf16>, vector<120x80xbf16>, vector<64x80xf32> -> vector<64x80xf32>
    %c0_45 = arith.constant 0 : index
    %c0_46 = arith.constant 0 : index
    %c0_47 = arith.constant 0 : index
    %64 = vector.load %arg6[%c0_45, %c0_46, %c0_47] : memref<5x120x80xbf16, #tpu.memory_space<vmem>>, vector<1x120x80xbf16>
    %65 = vector.shape_cast %64 : vector<1x120x80xbf16> to vector<120x80xbf16>
    %cst_48 = arith.constant dense<0.000000e+00> : vector<64x80xf32>
    %66 = tpu.matmul %60, %65, %cst_48 {dimension_numbers = #tpu.dot_dimension_numbers<[1], [0], [0], [1], [0, 0, 1, 1], [], []>} : vector<64x120xbf16>, vector<120x80xbf16>, vector<64x80xf32> -> vector<64x80xf32>
    %67 = vector.extract_strided_slice %58 {offsets = [1, 0, 0], sizes = [8, 8, 120], strides = [1, 1, 1]} : vector<12x8x120xbf16> to vector<8x8x120xbf16>
    %68 = vector.shape_cast %67 : vector<8x8x120xbf16> to vector<64x120xbf16>
    %c1_49 = arith.constant 1 : index
    %c0_50 = arith.constant 0 : index
    %c0_51 = arith.constant 0 : index
    %69 = vector.load %arg5[%c1_49, %c0_50, %c0_51] : memref<5x120x80xbf16, #tpu.memory_space<vmem>>, vector<1x120x80xbf16>
    %70 = vector.shape_cast %69 : vector<1x120x80xbf16> to vector<120x80xbf16>
    %cst_52 = arith.constant dense<0.000000e+00> : vector<64x80xf32>
    %71 = tpu.matmul %68, %70, %cst_52 {dimension_numbers = #tpu.dot_dimension_numbers<[1], [0], [0], [1], [0, 0, 1, 1], [], []>} : vector<64x120xbf16>, vector<120x80xbf16>, vector<64x80xf32> -> vector<64x80xf32>
    %c1_53 = arith.constant 1 : index
    %c0_54 = arith.constant 0 : index
    %c0_55 = arith.constant 0 : index
    %72 = vector.load %arg6[%c1_53, %c0_54, %c0_55] : memref<5x120x80xbf16, #tpu.memory_space<vmem>>, vector<1x120x80xbf16>
    %73 = vector.shape_cast %72 : vector<1x120x80xbf16> to vector<120x80xbf16>
    %cst_56 = arith.constant dense<0.000000e+00> : vector<64x80xf32>
    %74 = tpu.matmul %68, %73, %cst_56 {dimension_numbers = #tpu.dot_dimension_numbers<[1], [0], [0], [1], [0, 0, 1, 1], [], []>} : vector<64x120xbf16>, vector<120x80xbf16>, vector<64x80xf32> -> vector<64x80xf32>
    %75 = arith.addf %63, %71 : vector<64x80xf32>
    %76 = arith.addf %66, %74 : vector<64x80xf32>
    %77 = vector.extract_strided_slice %58 {offsets = [2, 0, 0], sizes = [8, 8, 120], strides = [1, 1, 1]} : vector<12x8x120xbf16> to vector<8x8x120xbf16>
    %78 = vector.shape_cast %77 : vector<8x8x120xbf16> to vector<64x120xbf16>
    %c2_57 = arith.constant 2 : index
    %c0_58 = arith.constant 0 : index
    %c0_59 = arith.constant 0 : index
    %79 = vector.load %arg5[%c2_57, %c0_58, %c0_59] : memref<5x120x80xbf16, #tpu.memory_space<vmem>>, vector<1x120x80xbf16>
    %80 = vector.shape_cast %79 : vector<1x120x80xbf16> to vector<120x80xbf16>
    %cst_60 = arith.constant dense<0.000000e+00> : vector<64x80xf32>
    %81 = tpu.matmul %78, %80, %cst_60 {dimension_numbers = #tpu.dot_dimension_numbers<[1], [0], [0], [1], [0, 0, 1, 1], [], []>} : vector<64x120xbf16>, vector<120x80xbf16>, vector<64x80xf32> -> vector<64x80xf32>
    %c2_61 = arith.constant 2 : index
    %c0_62 = arith.constant 0 : index
    %c0_63 = arith.constant 0 : index
    %82 = vector.load %arg6[%c2_61, %c0_62, %c0_63] : memref<5x120x80xbf16, #tpu.memory_space<vmem>>, vector<1x120x80xbf16>
    %83 = vector.shape_cast %82 : vector<1x120x80xbf16> to vector<120x80xbf16>
    %cst_64 = arith.constant dense<0.000000e+00> : vector<64x80xf32>
    %84 = tpu.matmul %78, %83, %cst_64 {dimension_numbers = #tpu.dot_dimension_numbers<[1], [0], [0], [1], [0, 0, 1, 1], [], []>} : vector<64x120xbf16>, vector<120x80xbf16>, vector<64x80xf32> -> vector<64x80xf32>
    %85 = arith.addf %75, %81 : vector<64x80xf32>
    %86 = arith.addf %76, %84 : vector<64x80xf32>
    %87 = vector.extract_strided_slice %58 {offsets = [3, 0, 0], sizes = [8, 8, 120], strides = [1, 1, 1]} : vector<12x8x120xbf16> to vector<8x8x120xbf16>
    %88 = vector.shape_cast %87 : vector<8x8x120xbf16> to vector<64x120xbf16>
    %c3_65 = arith.constant 3 : index
    %c0_66 = arith.constant 0 : index
    %c0_67 = arith.constant 0 : index
    %89 = vector.load %arg5[%c3_65, %c0_66, %c0_67] : memref<5x120x80xbf16, #tpu.memory_space<vmem>>, vector<1x120x80xbf16>
    %90 = vector.shape_cast %89 : vector<1x120x80xbf16> to vector<120x80xbf16>
    %cst_68 = arith.constant dense<0.000000e+00> : vector<64x80xf32>
    %91 = tpu.matmul %88, %90, %cst_68 {dimension_numbers = #tpu.dot_dimension_numbers<[1], [0], [0], [1], [0, 0, 1, 1], [], []>} : vector<64x120xbf16>, vector<120x80xbf16>, vector<64x80xf32> -> vector<64x80xf32>
    %c3_69 = arith.constant 3 : index
    %c0_70 = arith.constant 0 : index
    %c0_71 = arith.constant 0 : index
    %92 = vector.load %arg6[%c3_69, %c0_70, %c0_71] : memref<5x120x80xbf16, #tpu.memory_space<vmem>>, vector<1x120x80xbf16>
    %93 = vector.shape_cast %92 : vector<1x120x80xbf16> to vector<120x80xbf16>
    %cst_72 = arith.constant dense<0.000000e+00> : vector<64x80xf32>
    %94 = tpu.matmul %88, %93, %cst_72 {dimension_numbers = #tpu.dot_dimension_numbers<[1], [0], [0], [1], [0, 0, 1, 1], [], []>} : vector<64x120xbf16>, vector<120x80xbf16>, vector<64x80xf32> -> vector<64x80xf32>
    %95 = arith.addf %85, %91 : vector<64x80xf32>
    %96 = arith.addf %86, %94 : vector<64x80xf32>
    %97 = vector.extract_strided_slice %58 {offsets = [4, 0, 0], sizes = [8, 8, 120], strides = [1, 1, 1]} : vector<12x8x120xbf16> to vector<8x8x120xbf16>
    %98 = vector.shape_cast %97 : vector<8x8x120xbf16> to vector<64x120xbf16>
    %c4_73 = arith.constant 4 : index
    %c0_74 = arith.constant 0 : index
    %c0_75 = arith.constant 0 : index
    %99 = vector.load %arg5[%c4_73, %c0_74, %c0_75] : memref<5x120x80xbf16, #tpu.memory_space<vmem>>, vector<1x120x80xbf16>
    %100 = vector.shape_cast %99 : vector<1x120x80xbf16> to vector<120x80xbf16>
    %cst_76 = arith.constant dense<0.000000e+00> : vector<64x80xf32>
    %101 = tpu.matmul %98, %100, %cst_76 {dimension_numbers = #tpu.dot_dimension_numbers<[1], [0], [0], [1], [0, 0, 1, 1], [], []>} : vector<64x120xbf16>, vector<120x80xbf16>, vector<64x80xf32> -> vector<64x80xf32>
    %c4_77 = arith.constant 4 : index
    %c0_78 = arith.constant 0 : index
    %c0_79 = arith.constant 0 : index
    %102 = vector.load %arg6[%c4_77, %c0_78, %c0_79] : memref<5x120x80xbf16, #tpu.memory_space<vmem>>, vector<1x120x80xbf16>
    %103 = vector.shape_cast %102 : vector<1x120x80xbf16> to vector<120x80xbf16>
    %cst_80 = arith.constant dense<0.000000e+00> : vector<64x80xf32>
    %104 = tpu.matmul %98, %103, %cst_80 {dimension_numbers = #tpu.dot_dimension_numbers<[1], [0], [0], [1], [0, 0, 1, 1], [], []>} : vector<64x120xbf16>, vector<120x80xbf16>, vector<64x80xf32> -> vector<64x80xf32>
    %105 = arith.addf %95, %101 : vector<64x80xf32>
    %106 = arith.addf %96, %104 : vector<64x80xf32>
    %107 = arith.maximumf %105, %106 : vector<64x80xf32>
    %108 = vector.shape_cast %107 : vector<64x80xf32> to vector<4x2x8x80xf32>
    %cst_81 = arith.constant dense<0xFF800000> : vector<4x8x80xf32>
    %109 = vector.multi_reduction <maximumf>, %108, %cst_81 [1] : vector<4x2x8x80xf32> to vector<4x8x80xf32>
    %c0_82 = arith.constant 0 : index
    %c0_83 = arith.constant 0 : index
    %110 = vector.load %arg7[%c0_82, %c0_83] : memref<1x80xf32, #tpu.memory_space<vmem>>, vector<1x80xf32>
    %111 = vector.shape_cast %110 : vector<1x80xf32> to vector<1x1x80xf32>
    %112 = vector.broadcast %111 : vector<1x1x80xf32> to vector<4x8x80xf32>
    %113 = arith.addf %109, %112 : vector<4x8x80xf32>
    %cst_84 = arith.constant 0.000000e+00 : f32
    %114 = vector.broadcast %cst_84 : f32 to vector<4x8x80xf32>
    %115 = arith.maximumf %113, %114 : vector<4x8x80xf32>
    %116 = arith.truncf %115 : vector<4x8x80xf32> to vector<4x8x80xbf16>
    %117 = vector.extract_strided_slice %116 {offsets = [0, 0, 0], sizes = [1, 8, 80], strides = [1, 1, 1]} : vector<4x8x80xbf16> to vector<1x8x80xbf16>
    %118 = vector.shape_cast %117 : vector<1x8x80xbf16> to vector<8x80xbf16>
    %c0_85 = arith.constant 0 : index
    %c0_86 = arith.constant 0 : index
    %c0_87 = arith.constant 0 : index
    %119 = vector.load %arg8[%c0_85, %c0_86, %c0_87] : memref<4x80x50xbf16, #tpu.memory_space<vmem>>, vector<1x80x50xbf16>
    %120 = vector.shape_cast %119 : vector<1x80x50xbf16> to vector<80x50xbf16>
    %cst_88 = arith.constant dense<0.000000e+00> : vector<8x50xf32>
    %121 = tpu.matmul %118, %120, %cst_88 {dimension_numbers = #tpu.dot_dimension_numbers<[1], [0], [0], [1], [0, 0, 1, 1], [], []>} : vector<8x80xbf16>, vector<80x50xbf16>, vector<8x50xf32> -> vector<8x50xf32>
    %122 = vector.extract_strided_slice %116 {offsets = [1, 0, 0], sizes = [1, 8, 80], strides = [1, 1, 1]} : vector<4x8x80xbf16> to vector<1x8x80xbf16>
    %123 = vector.shape_cast %122 : vector<1x8x80xbf16> to vector<8x80xbf16>
    %c1_89 = arith.constant 1 : index
    %c0_90 = arith.constant 0 : index
    %c0_91 = arith.constant 0 : index
    %124 = vector.load %arg8[%c1_89, %c0_90, %c0_91] : memref<4x80x50xbf16, #tpu.memory_space<vmem>>, vector<1x80x50xbf16>
    %125 = vector.shape_cast %124 : vector<1x80x50xbf16> to vector<80x50xbf16>
    %cst_92 = arith.constant dense<0.000000e+00> : vector<8x50xf32>
    %126 = tpu.matmul %123, %125, %cst_92 {dimension_numbers = #tpu.dot_dimension_numbers<[1], [0], [0], [1], [0, 0, 1, 1], [], []>} : vector<8x80xbf16>, vector<80x50xbf16>, vector<8x50xf32> -> vector<8x50xf32>
    %127 = arith.addf %121, %126 : vector<8x50xf32>
    %128 = vector.extract_strided_slice %116 {offsets = [2, 0, 0], sizes = [1, 8, 80], strides = [1, 1, 1]} : vector<4x8x80xbf16> to vector<1x8x80xbf16>
    %129 = vector.shape_cast %128 : vector<1x8x80xbf16> to vector<8x80xbf16>
    %c2_93 = arith.constant 2 : index
    %c0_94 = arith.constant 0 : index
    %c0_95 = arith.constant 0 : index
    %130 = vector.load %arg8[%c2_93, %c0_94, %c0_95] : memref<4x80x50xbf16, #tpu.memory_space<vmem>>, vector<1x80x50xbf16>
    %131 = vector.shape_cast %130 : vector<1x80x50xbf16> to vector<80x50xbf16>
    %cst_96 = arith.constant dense<0.000000e+00> : vector<8x50xf32>
    %132 = tpu.matmul %129, %131, %cst_96 {dimension_numbers = #tpu.dot_dimension_numbers<[1], [0], [0], [1], [0, 0, 1, 1], [], []>} : vector<8x80xbf16>, vector<80x50xbf16>, vector<8x50xf32> -> vector<8x50xf32>
    %133 = arith.addf %127, %132 : vector<8x50xf32>
    %134 = vector.extract_strided_slice %116 {offsets = [3, 0, 0], sizes = [1, 8, 80], strides = [1, 1, 1]} : vector<4x8x80xbf16> to vector<1x8x80xbf16>
    %135 = vector.shape_cast %134 : vector<1x8x80xbf16> to vector<8x80xbf16>
    %c3_97 = arith.constant 3 : index
    %c0_98 = arith.constant 0 : index
    %c0_99 = arith.constant 0 : index
    %136 = vector.load %arg8[%c3_97, %c0_98, %c0_99] : memref<4x80x50xbf16, #tpu.memory_space<vmem>>, vector<1x80x50xbf16>
    %137 = vector.shape_cast %136 : vector<1x80x50xbf16> to vector<80x50xbf16>
    %cst_100 = arith.constant dense<0.000000e+00> : vector<8x50xf32>
    %138 = tpu.matmul %135, %137, %cst_100 {dimension_numbers = #tpu.dot_dimension_numbers<[1], [0], [0], [1], [0, 0, 1, 1], [], []>} : vector<8x80xbf16>, vector<80x50xbf16>, vector<8x50xf32> -> vector<8x50xf32>
    %139 = arith.addf %133, %138 : vector<8x50xf32>
    %c0_101 = arith.constant 0 : index
    %c0_102 = arith.constant 0 : index
    %140 = vector.load %arg9[%c0_101, %c0_102] : memref<1x50xf32, #tpu.memory_space<vmem>>, vector<1x50xf32>
    %141 = vector.broadcast %140 : vector<1x50xf32> to vector<8x50xf32>
    %142 = arith.addf %139, %141 : vector<8x50xf32>
    %cst_103 = arith.constant 0.000000e+00 : f32
    %143 = vector.broadcast %cst_103 : f32 to vector<8x50xf32>
    %144 = arith.maximumf %142, %143 : vector<8x50xf32>
    %145 = arith.truncf %144 : vector<8x50xf32> to vector<8x50xbf16>
    %c0_104 = arith.constant 0 : index
    %c0_105 = arith.constant 0 : index
    %146 = vector.load %arg10[%c0_104, %c0_105] : memref<50x10xbf16, #tpu.memory_space<vmem>>, vector<50x10xbf16>
    %cst_106 = arith.constant dense<0.000000e+00> : vector<8x10xf32>
    %147 = tpu.matmul %145, %146, %cst_106 {dimension_numbers = #tpu.dot_dimension_numbers<[1], [0], [0], [1], [0, 0, 1, 1], [], []>} : vector<8x50xbf16>, vector<50x10xbf16>, vector<8x10xf32> -> vector<8x10xf32>
    %c0_107 = arith.constant 0 : index
    %c0_108 = arith.constant 0 : index
    %148 = vector.load %arg11[%c0_107, %c0_108] : memref<1x10xf32, #tpu.memory_space<vmem>>, vector<1x10xf32>
    %149 = vector.broadcast %148 : vector<1x10xf32> to vector<8x10xf32>
    %150 = arith.addf %147, %149 : vector<8x10xf32>
    %cst_109 = arith.constant dense<0xFF800000> : vector<8xf32>
    %151 = vector.multi_reduction <maximumf>, %150, %cst_109 [1] : vector<8x10xf32> to vector<8xf32>
    %152 = vector.shape_cast %151 : vector<8xf32> to vector<8x1xf32>
    %153 = vector.broadcast %152 : vector<8x1xf32> to vector<8x10xf32>
    %154 = arith.subf %150, %153 : vector<8x10xf32>
    %155 = math.exp %154 : vector<8x10xf32>
    %cst_110 = arith.constant dense<0.000000e+00> : vector<8xf32>
    %156 = vector.multi_reduction <add>, %155, %cst_110 [1] : vector<8x10xf32> to vector<8xf32>
    %157 = vector.shape_cast %156 : vector<8xf32> to vector<8x1xf32>
    %158 = math.log %157 : vector<8x1xf32>
    %159 = arith.addf %158, %152 : vector<8x1xf32>
    %160 = vector.broadcast %159 : vector<8x1xf32> to vector<8x10xf32>
    %161 = arith.subf %150, %160 : vector<8x10xf32>
    %c0_111 = arith.constant 0 : index
    %c0_112 = arith.constant 0 : index
    %162 = vector.load %arg12[%c0_111, %c0_112] : memref<8x10xf32, #tpu.memory_space<vmem>>, vector<8x10xf32>
    tpu.vector_store %arg12[%c0_111, %c0_112], %161 {strides = array<i32>} : memref<8x10xf32, #tpu.memory_space<vmem>>, vector<8x10xf32>,
    return
  }
  func.func @transform_0(%arg0: i32) -> (i32, i32, i32) {
    %c0_i32 = arith.constant 0 : i32
    %c0_i32_0 = arith.constant 0 : i32
    %c0_i32_1 = arith.constant 0 : i32
    return %c0_i32, %arg0, %c0_i32_0 : i32, i32, i32
  }
  func.func @transform_1(%arg0: i32) -> (i32, i32, i32) {
    %c0_i32 = arith.constant 0 : i32
    %c0_i32_0 = arith.constant 0 : i32
    %c0_i32_1 = arith.constant 0 : i32
    %c0_i32_2 = arith.constant 0 : i32
    return %c0_i32, %c0_i32_0, %c0_i32_1 : i32, i32, i32
  }
  func.func @transform_2(%arg0: i32) -> (i32, i32, i32) {
    %c0_i32 = arith.constant 0 : i32
    %c0_i32_0 = arith.constant 0 : i32
    %c0_i32_1 = arith.constant 0 : i32
    %c0_i32_2 = arith.constant 0 : i32
    return %c0_i32, %c0_i32_0, %c0_i32_1 : i32, i32, i32
  }
  func.func @transform_3(%arg0: i32) -> (i32, i32) {
    %c0_i32 = arith.constant 0 : i32
    %c0_i32_0 = arith.constant 0 : i32
    %c0_i32_1 = arith.constant 0 : i32
    return %c0_i32, %c0_i32_0 : i32, i32
  }
  func.func @transform_4(%arg0: i32) -> (i32, i32, i32) {
    %c0_i32 = arith.constant 0 : i32
    %c0_i32_0 = arith.constant 0 : i32
    %c0_i32_1 = arith.constant 0 : i32
    %c0_i32_2 = arith.constant 0 : i32
    return %c0_i32, %c0_i32_0, %c0_i32_1 : i32, i32, i32
  }
  func.func @transform_5(%arg0: i32) -> (i32, i32, i32) {
    %c0_i32 = arith.constant 0 : i32
    %c0_i32_0 = arith.constant 0 : i32
    %c0_i32_1 = arith.constant 0 : i32
    %c0_i32_2 = arith.constant 0 : i32
    return %c0_i32, %c0_i32_0, %c0_i32_1 : i32, i32, i32
  }
  func.func @transform_6(%arg0: i32) -> (i32, i32) {
    %c0_i32 = arith.constant 0 : i32
    %c0_i32_0 = arith.constant 0 : i32
    %c0_i32_1 = arith.constant 0 : i32
    return %c0_i32, %c0_i32_0 : i32, i32
  }
  func.func @transform_7(%arg0: i32) -> (i32, i32, i32) {
    %c0_i32 = arith.constant 0 : i32
    %c0_i32_0 = arith.constant 0 : i32
    %c0_i32_1 = arith.constant 0 : i32
    %c0_i32_2 = arith.constant 0 : i32
    return %c0_i32, %c0_i32_0, %c0_i32_1 : i32, i32, i32
  }
  func.func @transform_8(%arg0: i32) -> (i32, i32) {
    %c0_i32 = arith.constant 0 : i32
    %c0_i32_0 = arith.constant 0 : i32
    %c0_i32_1 = arith.constant 0 : i32
    return %c0_i32, %c0_i32_0 : i32, i32
  }
  func.func @transform_9(%arg0: i32) -> (i32, i32) {
    %c0_i32 = arith.constant 0 : i32
    %c0_i32_0 = arith.constant 0 : i32
    %c0_i32_1 = arith.constant 0 : i32
    return %c0_i32, %c0_i32_0 : i32, i32
  }
  func.func @transform_10(%arg0: i32) -> (i32, i32) {
    %c0_i32 = arith.constant 0 : i32
    %c0_i32_0 = arith.constant 0 : i32
    %c0_i32_1 = arith.constant 0 : i32
    return %c0_i32, %c0_i32_0 : i32, i32
  }
  func.func @transform_11(%arg0: i32) -> (i32, i32) {
    %c0_i32 = arith.constant 0 : i32
    %c0_i32_0 = arith.constant 0 : i32
    return %arg0, %c0_i32 : i32, i32
  }
}

</mosaic_0001>

<bundles_post_ra>
// kernel: clsnet_forward.1
= control target key start
LH: loop header
LB: loop body
LE: loop exit
PB: predicated region body
PF: predicated region fallthrough
CT: control target
= control target key end

     0   :  { %vm188_vm0 = vcmask 1045504   ;;  %vm151_vm1 = vcmask 228352   ;;  %vm2082_vm2 = vcmask 1043456   ;;  %vm1879_vm3 = vcmask 982016   ;;  %s6842_s1 = inlined_call_operand.vmem [shape: bf16[5,28,120], index: 1, kind: input, shape index: {}]   ;;  %s6843_s0 = inlined_call_operand.vmem [shape: bf16[28,8,28], index: 0, kind: input, shape index: {}]   ;;  %s6844_s2 = inlined_call_operand.vmem [shape: bf16[5,28,120], index: 2, kind: input, shape index: {}]   ;;  %s6845_s4 = inlined_call_operand.vmem [shape: bf16[5,120,80], index: 4, kind: input, shape index: {}]   ;;  %s6846_s5 = inlined_call_operand.vmem [shape: bf16[5,120,80], index: 5, kind: input, shape index: {}]   ;;  %s6847_s3 = inlined_call_operand.vmem [shape: f32[1,120], index: 3, kind: input, shape index: {}]   ;;  %s6848_s7 = inlined_call_operand.vmem [shape: bf16[4,80,50], index: 7, kind: input, shape index: {}]   ;;  %s6849_s6 = inlined_call_operand.vmem [shape: f32[1,80], index: 6, kind: input, shape index: {}]   ;;  %s6850_s9 = inlined_call_operand.vmem [shape: bf16[50,10], index: 9, kind: input, shape index: {}]   ;;  %s6851_s8 = inlined_call_operand.vmem [shape: f32[1,50], index: 8, kind: input, shape index: {}]   ;;  %s6852_s10 = inlined_call_operand.vmem [shape: f32[1,10], index: 10, kind: input, shape index: {}]   ;;  %s6853_s11 = inlined_call_operand.vmem [shape: f32[8,10], index: 11, kind: output, shape index: {}]  }
   0x1   :  { %v5537_v0 = vld [vmem:[%s6842_s1 + $0x10] sm:$0xff]   ;;  %v5538_v1 = vld [vmem:[%s6842_s1 + $0x18] sm:$0x3f]   ;;  %v5763_v2 = vld [vmem:[%s6843_s0 + $0x4] sm:$0xf]  ;;  %vm5693_vm4 = vmmov 0  }
   0x2   :  { %4666 = vmatprep.subr.bf16.mxu0 %v5537_v0  ;;  %5254 = vmatprep.subr.bf16.mxu1 %v5537_v0  ;;  %v5768_v3 = vld [vmem:[%s6843_s0 + $0x8] sm:$0xf]  ;;  %v190_v4 = vsel %vm188_vm0, %v5538_v1, 0  ;;  %v5774_v5 = vld [vmem:[%s6843_s0 + $0xc] sm:$0xf]  ;;  %v5547_v8 = vld [vmem:[%s6844_s2 + $0x10] sm:$0xff]  }
   0x3   :  { %4667 = vmatpush3.bf16.msra.mxu0 %v5537_v0  ;;  %5256 = vmatpush3.bf16.msra.mxu1 %v5537_v0  ;;  %v5779_v6 = vld [vmem:[%s6843_s0 + $0x10] sm:$0xf]  ;;  %v3857_v7 = vcombine.low %v5763_v2, %v5768_v3  ;;  %v5791_v9 = vld [vmem:[%s6843_s0 + $0x14] sm:$0xf]  ;;  %v61_v11 = vld [vmem:[%s6843_s0 + $0x58] sm:$0xf]  ;;  %v3902_v53 = vcombine.low %v5768_v3, %v5774_v5 }
   0x4   :  { %5514 = vmatprep.subr.msk.bf16.mxu0 %vm188_vm0, %v5538_v1  ;;  %5515 = vmatprep.subr.msk.bf16.mxu1 %vm188_vm0, %v5538_v1  ;;  %v5796_v10 = vld [vmem:[%s6843_s0 + $0x54] sm:$0xf]  ;;  %v62_v13 = vld [vmem:[%s6843_s0 + $0x5c] sm:$0xf]  ;;  %v5811_v14 = vld [vmem:[%s6843_s0 + $0x60] sm:$0xf]  ;;  %v5815_v15 = vcombine.low %v5774_v5, %v5779_v6  ;;  %v5983_v54 = vcombine.low %v5779_v6, %v5791_v9 }
   0x5   :  { %4670 = vmatprep.mubr.msk.bf16.mxu0 %vm151_vm1, %v3857_v7  ;;  %v5803_v12 = vcombine.low %v5796_v10, %v61_v11  ;;  %v5818_v16 = vcombine.low %v62_v13, %v5811_v14  ;;  %v5820_v17 = vcombine.low %v61_v11, %v62_v13  ;;  %v5825_v18 = vld [vmem:[%s6843_s0 + $0x18] sm:$0xf]  ;;  %v5843_v21 = vld [vmem:[%s6843_s0 + $0x1c] sm:$0xf]  ;;  %v5850_v22 = vld [vmem:[%s6843_s0 + $0x20] sm:$0xf] }
   0x6   :  { %v5548_v19 = vld [vmem:[%s6844_s2 + $0x18] sm:$0x3f]   ;;  %v5834_v20 = vcombine.low %v5791_v9, %v5825_v18  ;;  %v5557_v23 = vld [vmem:[%s6842_s1] sm:$0xff]   ;;  %v5869_v27 = vld [vmem:[%s6843_s0 + $0x28] sm:$0xf]  ;;  %v5873_v28 = vcombine.low %v5843_v21, %v5850_v22  ;;  %v6002_v58 = vcombine.low %v5825_v18, %v5843_v21  ;;  %vm3372_vm5 = vcmask 654336  }
   0x7   :  { %4669 = vmatpush3.bf16.msra.mxu0 %v190_v4  ;;  %5257 = vmatpush3.bf16.msra.mxu1 %v190_v4  ;;  %v338_v24 = vsel %vm188_vm0, %v5548_v19, 0  ;;  %v5552_v25 = vld [vmem:[%s6844_s2] sm:$0xff]   ;;  %v5567_v30 = vld [vmem:[%s6844_s2 + $0x8] sm:$0x3f]   ;;  %v5893_v33 = vld [vmem:[%s6843_s0 + $0x30] sm:$0xf] }
   0x8   :  { %4690 = vmatprep.mubr.msk.bf16.mxu1 %vm151_vm1, %v5803_v12  ;;  %4694 = vmatprep.subr.bf16.mxu1 %v5547_v8  ;;  %v5864_v26 = vld [vmem:[%s6843_s0 + $0x24] sm:$0xf]  ;;  %v5568_v31 = vld [vmem:[%s6842_s1 + $0x8] sm:$0x3f]   ;;  %v52_v34 = vld [vmem:[%s6843_s0 + $0x34] sm:$0xf] }
   0x9   :  { %4722 = vmatprep.subr.bf16.mxu0 %v5557_v23  ;;  %v5877_v29 = vcombine.low %v5864_v26, %v5869_v27  ;;  %v5888_v32 = vld [vmem:[%s6843_s0 + $0x2c] sm:$0xf]  ;;  %v5905_v35 = vld [vmem:[%s6843_s0 + $0x38] sm:$0xf]  ;;  %v531_v36 = vsel %vm188_vm0, %v5568_v31, 0  ;;  %v5569_v37 = vld [vmem:[%s6842_s1 + $0x20] sm:$0xff]   ;;  %v6006_v59 = vcombine.low %v5850_v22, %v5864_v26  ;;  %v6020_v61 = vcombine.low %v5893_v33, %v52_v34 }
   0xa   :  { %4671 = vmatmul.mubr.msk.bf16.vlgmr.msra.gmra.mrb[0].mxu0 %vm151_vm1, %v5815_v15  ;;  %4691 = vmatmul.mubr.msk.bf16.vlgmr.msra.gmra.mrb[0].mxu1 %vm151_vm1, %v5818_v16  ;;  %v674_v38 = vsel %vm188_vm0, %v5567_v30, 0  ;;  %v5570_v39 = vld [vmem:[%s6844_s2 + $0x20] sm:$0xff]   ;;  %v5923_v40 = vcombine.low %v5888_v32, %v5893_v33  ;;  %v5926_v41 = vcombine.low %v52_v34, %v5905_v35  ;;  %v54_v42 = vld [vmem:[%s6843_s0 + $0x3c] sm:$0xf]  ;;  %v57_v45 = vld [vmem:[%s6843_s0 + $0x48] sm:$0xf]  ;;  %v6017_v60 = vcombine.low %v5869_v27, %v5888_v32 }
   0xb   :  { %4695 = vmatpush3.bf16.msra.mxu1 %v5547_v8  ;;  %4674 = vmatprep.mubr.msk.bf16.mxu0 %vm151_vm1, %v5834_v20  ;;  %v55_v43 = vld [vmem:[%s6843_s0 + $0x40] sm:$0xf]  ;;  %v56_v44 = vld [vmem:[%s6843_s0 + $0x44] sm:$0xf]  ;;  %v58_v48 = vld [vmem:[%s6843_s0 + $0x4c] sm:$0xf]  ;;  %v6038_v1 = vcombine.low %v5905_v35, %v54_v42 }
   0xc   :  { %5516 = vmatprep.subr.msk.bf16.mxu1 %vm188_vm0, %v5548_v19  ;;  %4698 = vmatprep.mubr.msk.bf16.mxu1 %vm151_vm1, %v3857_v7  ;;  %v5948_v46 = vcombine.low %v54_v42, %v55_v43  ;;  %v5950_v47 = vcombine.low %v56_v44, %v57_v45  ;;  %v59_v49 = vld [vmem:[%s6843_s0 + $0x50] sm:$0xf]  ;;  %v39_v50 = vld [vmem:[%s6843_s0] sm:$0xf]  ;;  %v5571_v55 = vld [vmem:[%s6842_s1 + $0x28] sm:$0x3f]   ;;  %v6050_v3 = vcombine.low %v57_v45, %v58_v48 }
   0xd   :  { %4723 = vmatpush3.bf16.msra.mxu0 %v5557_v23  ;;  %v5969_v51 = vcombine.low %v58_v48, %v59_v49  ;;  %v3901_v52 = vcombine.low %v39_v50, %v5763_v2  ;;  %v828_v56 = vsel %vm188_vm0, %v5571_v55, 0  ;;  %v5573_v57 = vld [vmem:[%s6842_s1 + $0x30] sm:$0xff]   ;;  %v5572_v62 = vld [vmem:[%s6844_s2 + $0x28] sm:$0x3f]   ;;  %v6040_v2 = vcombine.low %v55_v43, %v56_v44  ;;  %v5576_v5 = vld [vmem:[%s6842_s1 + $0x38] sm:$0x3f]  }
   0xe   :  { %5517 = vmatprep.subr.msk.bf16.mxu0 %vm188_vm0, %v5568_v31  ;;  %v976_v63 = vsel %vm188_vm0, %v5572_v62, 0  ;;  %v5574_v0 = vld [vmem:[%s6844_s2 + $0x30] sm:$0xff]   ;;  %v6053_v4 = vcombine.low %v59_v49, %v5796_v10  ;;  %v1178_v6 = vsel %vm188_vm0, %v5576_v5, 0  ;;  %v5578_v7 = vld [vmem:[%s6842_s1 + $0x40] sm:$0xff]   ;;  %v5577_v8 = vld [vmem:[%s6844_s2 + $0x38] sm:$0x3f]  }
   0xf   :  { %4697 = vmatpush3.bf16.msra.mxu1 %v338_v24  ;;  %v1326_v9 = vsel %vm188_vm0, %v5577_v8, 0  ;;  %v5579_v10 = vld [vmem:[%s6844_s2 + $0x40] sm:$0xff]   ;;  %v5581_v11 = vld [vmem:[%s6842_s1 + $0x48] sm:$0x3f]   ;;  %v5590_v31 = vld [vmem:[%s6845_s4 + $0x54] sm:$0xff]   ;;  %vm3790_vm6 = vcmask 1040384  }
  0x10   :  { %4750 = vmatprep.subr.bf16.mxu1 %v5552_v25  ;;  %v5582_v13 = vld [vmem:[%s6844_s2 + $0x48] sm:$0x3f]   ;;  %v1528_v18 = vsel %vm188_vm0, %v5581_v11, 0  ;;  %v64_v21 = vld [vmem:[%s6843_s0 + $0x64] sm:$0xf]  ;;  %v5585_v23 = vld [vmem:[%s6846_s5 + $0x3c] sm:$0xff]  }
  0x11   :  { %4725 = vmatpush3.bf16.msra.mxu0 %v531_v36  ;;  %v1676_v19 = vsel %vm188_vm0, %v5582_v13, 0  ;;  %v6137_v22 = vcombine.low %v5811_v14, %v64_v21  ;;  %v5584_v14 = vld [vmem:[%s6845_s4 + $0x3c] sm:$0xff]   ;;  %v66_v26 = vld [vmem:[%s6843_s0 + $0x6c] sm:$0xf]  ;;  %v5591_v32 = vld [vmem:[%s6846_s5 + $0x54] sm:$0xff]   ;;  %vm3786_vm7 = vcmask 408576  }
  0x12   :  { %4675 = vmatmul.mubr.msk.bf16.gmra.mrb[4].mxu0 %vm151_vm1, %v5873_v28  ;;  %4699 = vmatmul.mubr.msk.bf16.vlgmr.msra.gmra.mrb[4].mxu1 %vm151_vm1, %v5815_v15  ;;  %v5592_v33 = vld [vmem:[%s6845_s4 + $0x5c] sm:$0xff]   ;;  %v5594_v35 = vld [vmem:[%s6845_s4 + $0x64] sm:$0xff]   ;;  %vm3834_vm8 = vcmask 80896  }
  0x13   :  { %4751 = vmatpush3.bf16.msra.mxu1 %v5552_v25  ;;  %4678 = vmatprep.mubr.msk.bf16.mxu0 %vm151_vm1, %v5877_v29  ;;  %v5593_v34 = vld [vmem:[%s6846_s5 + $0x5c] sm:$0xff]   ;;  %v5595_v36 = vld [vmem:[%s6846_s5 + $0x64] sm:$0xff]  }
  0x14   :  { %4702 = vmatprep.mubr.msk.bf16.mxu1 %vm151_vm1, %v5834_v20  ;;  %5518 = vmatprep.subr.msk.bf16.mxu1 %vm188_vm0, %v5567_v30  ;;  %v5589_v30 = vld [vmem:[%s6846_s5 + $0x4c] sm:$0xff]   ;;  %v6314_v43 = vld [vmem:[%s6845_s4] sm:$0xff]  }
  0x15   :  { %4778 = vmatprep.subr.bf16.mxu0 %v5569_v37  ;;  %v6319_v44 = vld [vmem:[%s6846_s5] sm:$0xff]  }
  0x17   :  { %4753 = vmatpush3.bf16.msra.mxu1 %v674_v38  ;;  %v5597_v38 = vld [vmem:[%s6846_s5 + $0x6c] sm:$0xff]  }
  0x18   :  { %4806 = vmatprep.subr.bf16.mxu1 %v5570_v39 }
  0x1a   :  { %4679 = vmatmul.mubr.msk.bf16.gmra.mrb[8].mxu0 %vm151_vm1, %v5923_v40  ;;  %4703 = vmatmul.mubr.msk.bf16.gmra.mrb[8].mxu1 %vm151_vm1, %v5873_v28 }
  0x1b   :  { %4682 = vmatprep.mubr.msk.bf16.mxu0 %vm151_vm1, %v5926_v41  ;;  %4706 = vmatprep.mubr.msk.bf16.mxu1 %vm151_vm1, %v5877_v29 }
  0x22   :  { %4683 = vmatmul.mubr.msk.bf16.gmra.mrb[12].mxu0 %vm151_vm1, %v5948_v46  ;;  %4707 = vmatmul.mubr.msk.bf16.gmra.mrb[12].mxu1 %vm151_vm1, %v5923_v40 }
  0x23   :  { %4686 = vmatprep.mubr.msk.bf16.mxu0 %vm151_vm1, %v5950_v47  ;;  %4710 = vmatprep.mubr.msk.bf16.mxu1 %vm151_vm1, %v5926_v41 }
  0x2a   :  { %4687 = vmatmul.mubr.msk.bf16.gmra.mrb[16].mxu0 %vm151_vm1, %v5969_v51  ;;  %4711 = vmatmul.mubr.msk.bf16.gmra.mrb[16].mxu1 %vm151_vm1, %v5948_v46 }
  0x2b   :  { %4714 = vmatprep.mubr.msk.bf16.mxu1 %vm151_vm1, %v5950_v47  ;;  %4726 = vmatprep.mubr.msk.bf16.mxu0 %vm151_vm1, %v3901_v52 }
  0x32   :  { %4715 = vmatmul.mubr.msk.bf16.gmra.mrb[20].mxu1 %vm151_vm1, %v5969_v51  ;;  %4727 = vmatmul.mubr.msk.bf16.vlgmr.msra.gmra.mrb[0].mxu0 %vm151_vm1, %v3902_v53 }
  0x33   :  { %4718 = vmatprep.mubr.msk.bf16.mxu1 %vm151_vm1, %v5803_v12  ;;  %4730 = vmatprep.mubr.msk.bf16.mxu0 %vm151_vm1, %v5983_v54 }
  0x34   :  { %4779 = vmatpush3.bf16.msra.mxu0 %v5569_v37  ;;  %v5596_v37 = vld [vmem:[%s6845_s4 + $0x6c] sm:$0xff]  }
  0x35   :  { %5519 = vmatprep.subr.msk.bf16.mxu0 %vm188_vm0, %v5571_v55 }
  0x38   :  { %4781 = vmatpush3.bf16.msra.mxu0 %v828_v56 }
  0x39   :  { %4834 = vmatprep.subr.bf16.mxu0 %v5573_v57 }
  0x3a   :  { %4719 = vmatmul.mubr.msk.bf16.gmra.mrb[24].mxu1 %vm151_vm1, %v5818_v16  ;;  %4731 = vmatmul.mubr.msk.bf16.gmra.mrb[4].mxu0 %vm151_vm1, %v6002_v58 }
  0x3b   :  { %4734 = vmatprep.mubr.msk.bf16.mxu0 %vm151_vm1, %v6006_v59  ;;  %4754 = vmatprep.mubr.msk.bf16.mxu1 %vm151_vm1, %v3901_v52 }
  0x42   :  { %4735 = vmatmul.mubr.msk.bf16.gmra.mrb[8].mxu0 %vm151_vm1, %v6017_v60  ;;  %4755 = vmatmul.mubr.msk.bf16.vlgmr.msra.gmra.mrb[4].mxu1 %vm151_vm1, %v3902_v53 }
  0x43   :  { %4807 = vmatpush3.bf16.msra.mxu1 %v5570_v39  ;;  %4738 = vmatprep.mubr.msk.bf16.mxu0 %vm151_vm1, %v6020_v61  ;;  %v5598_v39 = vld [vmem:[%s6845_s4 + $0x74] ss:$0 sps:$4 sm:$0xff]  }
  0x44   :  { %4758 = vmatprep.mubr.msk.bf16.mxu1 %vm151_vm1, %v5983_v54  ;;  %5520 = vmatprep.subr.msk.bf16.mxu1 %vm188_vm0, %v5572_v62 }
  0x47   :  { %4809 = vmatpush3.bf16.msra.mxu1 %v976_v63 }
  0x48   :  { %4862 = vmatprep.subr.bf16.mxu1 %v5574_v0 }
  0x4a   :  { %4739 = vmatmul.mubr.msk.bf16.gmra.mrb[12].mxu0 %vm151_vm1, %v6038_v1  ;;  %4759 = vmatmul.mubr.msk.bf16.gmra.mrb[8].mxu1 %vm151_vm1, %v6002_v58 }
  0x4b   :  { %4742 = vmatprep.mubr.msk.bf16.mxu0 %vm151_vm1, %v6040_v2  ;;  %4762 = vmatprep.mubr.msk.bf16.mxu1 %vm151_vm1, %v6006_v59 }
  0x52   :  { %4743 = vmatmul.mubr.msk.bf16.gmra.mrb[16].mxu0 %vm151_vm1, %v6050_v3  ;;  %4763 = vmatmul.mubr.msk.bf16.gmra.mrb[12].mxu1 %vm151_vm1, %v6017_v60 }
  0x53   :  { %4746 = vmatprep.mubr.msk.bf16.mxu0 %vm151_vm1, %v6053_v4  ;;  %4766 = vmatprep.mubr.msk.bf16.mxu1 %vm151_vm1, %v6020_v61 }
  0x5a   :  { %4747 = vmatmul.mubr.msk.bf16.gmra.mrb[20].mxu0 %vm151_vm1, %v5820_v17  ;;  %4767 = vmatmul.mubr.msk.bf16.gmra.mrb[16].mxu1 %vm151_vm1, %v6038_v1 }
  0x5b   :  { %4770 = vmatprep.mubr.msk.bf16.mxu1 %vm151_vm1, %v6040_v2  ;;  %4782 = vmatprep.mubr.msk.bf16.mxu0 %vm151_vm1, %v3902_v53 }
  0x62   :  { %4771 = vmatmul.mubr.msk.bf16.gmra.mrb[20].mxu1 %vm151_vm1, %v6050_v3  ;;  %4783 = vmatmul.mubr.msk.bf16.vlgmr.msra.gmra.mrb[0].mxu0 %vm151_vm1, %v5983_v54 }
  0x63   :  { %4774 = vmatprep.mubr.msk.bf16.mxu1 %vm151_vm1, %v6053_v4  ;;  %4786 = vmatprep.mubr.msk.bf16.mxu0 %vm151_vm1, %v6002_v58 }
  0x64   :  { %4835 = vmatpush3.bf16.msra.mxu0 %v5573_v57 }
  0x65   :  { %5521 = vmatprep.subr.msk.bf16.mxu0 %vm188_vm0, %v5576_v5 }
  0x68   :  { %4837 = vmatpush3.bf16.msra.mxu0 %v1178_v6 }
  0x69   :  { %4890 = vmatprep.subr.bf16.mxu0 %v5578_v7 }
  0x6a   :  { %4775 = vmatmul.mubr.msk.bf16.gmra.mrb[24].mxu1 %vm151_vm1, %v5820_v17  ;;  %4787 = vmatmul.mubr.msk.bf16.gmra.mrb[4].mxu0 %vm151_vm1, %v6006_v59 }
  0x6b   :  { %4790 = vmatprep.mubr.msk.bf16.mxu0 %vm151_vm1, %v6017_v60  ;;  %4810 = vmatprep.mubr.msk.bf16.mxu1 %vm151_vm1, %v3902_v53 }
  0x72   :  { %4791 = vmatmul.mubr.msk.bf16.gmra.mrb[8].mxu0 %vm151_vm1, %v6020_v61  ;;  %4811 = vmatmul.mubr.msk.bf16.vlgmr.msra.gmra.mrb[4].mxu1 %vm151_vm1, %v5983_v54 }
  0x73   :  { %4863 = vmatpush3.bf16.msra.mxu1 %v5574_v0  ;;  %4794 = vmatprep.mubr.msk.bf16.mxu0 %vm151_vm1, %v6038_v1 }
  0x74   :  { %4814 = vmatprep.mubr.msk.bf16.mxu1 %vm151_vm1, %v6002_v58  ;;  %5522 = vmatprep.subr.msk.bf16.mxu1 %vm188_vm0, %v5577_v8 }
  0x77   :  { %4865 = vmatpush3.bf16.msra.mxu1 %v1326_v9 }
  0x78   :  { %4918 = vmatprep.subr.bf16.mxu1 %v5579_v10 }
  0x7a   :  { %4795 = vmatmul.mubr.msk.bf16.gmra.mrb[12].mxu0 %vm151_vm1, %v6040_v2  ;;  %4815 = vmatmul.mubr.msk.bf16.gmra.mrb[8].mxu1 %vm151_vm1, %v6006_v59 }
  0x7b   :  { %4798 = vmatprep.mubr.msk.bf16.mxu0 %vm151_vm1, %v6050_v3  ;;  %4818 = vmatprep.mubr.msk.bf16.mxu1 %vm151_vm1, %v6017_v60 }
  0x82   :  { %4799 = vmatmul.mubr.msk.bf16.gmra.mrb[16].mxu0 %vm151_vm1, %v6053_v4  ;;  %4819 = vmatmul.mubr.msk.bf16.gmra.mrb[12].mxu1 %vm151_vm1, %v6020_v61 }
  0x83   :  { %4802 = vmatprep.mubr.msk.bf16.mxu0 %vm151_vm1, %v5820_v17  ;;  %4822 = vmatprep.mubr.msk.bf16.mxu1 %vm151_vm1, %v6038_v1 }
  0x8a   :  { %4803 = vmatmul.mubr.msk.bf16.gmra.mrb[20].mxu0 %vm151_vm1, %v6137_v22  ;;  %4823 = vmatmul.mubr.msk.bf16.gmra.mrb[16].mxu1 %vm151_vm1, %v6040_v2 }
  0x8b   :  { %4826 = vmatprep.mubr.msk.bf16.mxu1 %vm151_vm1, %v6050_v3  ;;  %4838 = vmatprep.mubr.msk.bf16.mxu0 %vm151_vm1, %v5815_v15 }
  0x92   :  { %4827 = vmatmul.mubr.msk.bf16.gmra.mrb[20].mxu1 %vm151_vm1, %v6053_v4  ;;  %4839 = vmatmul.mubr.msk.bf16.vlgmr.msra.gmra.mrb[0].mxu0 %vm151_vm1, %v5834_v20 }
  0x93   :  { %4830 = vmatprep.mubr.msk.bf16.mxu1 %vm151_vm1, %v5820_v17  ;;  %4842 = vmatprep.mubr.msk.bf16.mxu0 %vm151_vm1, %v5873_v28 }
  0x94   :  { %4891 = vmatpush3.bf16.msra.mxu0 %v5578_v7 }
  0x95   :  { %5523 = vmatprep.subr.msk.bf16.mxu0 %vm188_vm0, %v5581_v11 }
  0x98   :  { %4893 = vmatpush3.bf16.msra.mxu0 %v1528_v18 }
  0x99   :  { %4946 = vmatprep.subr.bf16.mxu0 %v5584_v14 }
  0x9a   :  { %4831 = vmatmul.mubr.msk.bf16.gmra.mrb[24].mxu1 %vm151_vm1, %v6137_v22  ;;  %4843 = vmatmul.mubr.msk.bf16.gmra.mrb[4].mxu0 %vm151_vm1, %v5877_v29 }
  0x9b   :  { %4846 = vmatprep.mubr.msk.bf16.mxu0 %vm151_vm1, %v5923_v40  ;;  %4866 = vmatprep.mubr.msk.bf16.mxu1 %vm151_vm1, %v5815_v15  ;;  %v65_v15 = vld [vmem:[%s6843_s0 + $0x68] sm:$0xf] }
  0x9c   :  { %v4019_v27 = vcombine.low %v65_v15, %v66_v26 }
  0xa2   :  { %4847 = vmatmul.mubr.msk.bf16.gmra.mrb[8].mxu0 %vm151_vm1, %v5926_v41  ;;  %4867 = vmatmul.mubr.msk.bf16.vlgmr.msra.gmra.mrb[4].mxu1 %vm151_vm1, %v5834_v20  ;;  %v3982_v20 = vcombine.low %v64_v21, %v65_v15 }
  0xa3   :  { %4919 = vmatpush3.bf16.msra.mxu1 %v5579_v10  ;;  %4850 = vmatprep.mubr.msk.bf16.mxu0 %vm151_vm1, %v5948_v46 }
  0xa4   :  { %4870 = vmatprep.mubr.msk.bf16.mxu1 %vm151_vm1, %v5873_v28  ;;  %5524 = vmatprep.subr.msk.bf16.mxu1 %vm188_vm0, %v5582_v13  ;;  %v5586_v28 = vld [vmem:[%s6845_s4 + $0x44] sm:$0xff]  }
  0xa7   :  { %4921 = vmatpush3.bf16.msra.mxu1 %v1676_v19 }
  0xa8   :  { %4970 = vmatprep.subr.bf16.mxu1 %v5585_v23 }
  0xaa   :  { %4851 = vmatmul.mubr.msk.bf16.gmra.mrb[12].mxu0 %vm151_vm1, %v5950_v47  ;;  %4871 = vmatmul.mubr.msk.bf16.gmra.mrb[8].mxu1 %vm151_vm1, %v5877_v29  ;;  %v5587_v29 = vld [vmem:[%s6846_s5 + $0x44] sm:$0xff]  }
  0xab   :  { %4854 = vmatprep.mubr.msk.bf16.mxu0 %vm151_vm1, %v5969_v51  ;;  %4874 = vmatprep.mubr.msk.bf16.mxu1 %vm151_vm1, %v5923_v40  ;;  %v5599_v40 = vld [vmem:[%s6846_s5 + $0x74] ss:$0 sps:$4 sm:$0xff]  }
  0xac   :  { %v2213_v42 = vsel %vm2082_vm2, %v5599_v40, 0 }
  0xb2   :  { %4855 = vmatmul.mubr.msk.bf16.gmra.mrb[16].mxu0 %vm151_vm1, %v5803_v12  ;;  %4875 = vmatmul.mubr.msk.bf16.gmra.mrb[12].mxu1 %vm151_vm1, %v5926_v41  ;;  %v2084_v41 = vsel %vm2082_vm2, %v5598_v39, 0 }
  0xb3   :  { %4858 = vmatprep.mubr.msk.bf16.mxu0 %vm151_vm1, %v5818_v16  ;;  %4878 = vmatprep.mubr.msk.bf16.mxu1 %vm151_vm1, %v5948_v46 }
  0xba   :  { %4859 = vmatmul.mubr.msk.bf16.gmra.mrb[20].mxu0 %vm151_vm1, %v3982_v20  ;;  %4879 = vmatmul.mubr.msk.bf16.gmra.mrb[16].mxu1 %vm151_vm1, %v5950_v47 }
  0xbb   :  { %4882 = vmatprep.mubr.msk.bf16.mxu1 %vm151_vm1, %v5969_v51  ;;  %4894 = vmatprep.mubr.msk.bf16.mxu0 %vm151_vm1, %v5983_v54 }
  0xc2   :  { %4883 = vmatmul.mubr.msk.bf16.gmra.mrb[20].mxu1 %vm151_vm1, %v5803_v12  ;;  %4895 = vmatmul.mubr.msk.bf16.vlgmr.msra.gmra.mrb[0].mxu0 %vm151_vm1, %v6002_v58 }
  0xc3   :  { %4886 = vmatprep.mubr.msk.bf16.mxu1 %vm151_vm1, %v5818_v16  ;;  %4898 = vmatprep.mubr.msk.bf16.mxu0 %vm151_vm1, %v6006_v59 }
  0xc4   :  { %4947 = vmatpush3.bf16.msra.mxu0 %v5584_v14 }
  0xc5   :  { %4948 = vmatprep.subr.bf16.mxu0 %v5586_v28 }
  0xc8   :  { %4949 = vmatpush3.bf16.msra.mxu0 %v5586_v28 }
  0xca   :  { %4887 = vmatmul.mubr.msk.bf16.gmra.mrb[24].mxu1 %vm151_vm1, %v3982_v20  ;;  %4899 = vmatmul.mubr.msk.bf16.gmra.mrb[4].mxu0 %vm151_vm1, %v6017_v60 }
  0xcb   :  { %4902 = vmatprep.mubr.msk.bf16.mxu0 %vm151_vm1, %v6020_v61  ;;  %4922 = vmatprep.mubr.msk.bf16.mxu1 %vm151_vm1, %v5983_v54 }
  0xd2   :  { %4903 = vmatmul.mubr.msk.bf16.gmra.mrb[8].mxu0 %vm151_vm1, %v6038_v1  ;;  %4923 = vmatmul.mubr.msk.bf16.vlgmr.msra.gmra.mrb[4].mxu1 %vm151_vm1, %v6002_v58 }
  0xd3   :  { %4906 = vmatprep.mubr.msk.bf16.mxu0 %vm151_vm1, %v6040_v2  ;;  %4926 = vmatprep.mubr.msk.bf16.mxu1 %vm151_vm1, %v6006_v59 }
  0xd4   :  { %4971 = vmatpush3.bf16.msra.mxu1 %v5585_v23 }
  0xd5   :  { %4972 = vmatprep.subr.bf16.mxu1 %v5587_v29 }
  0xd8   :  { %4973 = vmatpush3.bf16.msra.mxu1 %v5587_v29 }
  0xd9   :  { %4974 = vmatprep.subr.bf16.mxu1 %v5589_v30 }
  0xda   :  { %4907 = vmatmul.mubr.msk.bf16.gmra.mrb[12].mxu0 %vm151_vm1, %v6050_v3  ;;  %4927 = vmatmul.mubr.msk.bf16.gmra.mrb[8].mxu1 %vm151_vm1, %v6017_v60 }
  0xdb   :  { %4910 = vmatprep.mubr.msk.bf16.mxu0 %vm151_vm1, %v6053_v4  ;;  %4930 = vmatprep.mubr.msk.bf16.mxu1 %vm151_vm1, %v6020_v61 }
  0xdc   :  { %4975 = vmatpush3.bf16.msra.mxu1 %v5589_v30 }
  0xdd   :  { %v6236_v12 = vpop.f32.mrb[0].mxu1  ;;  %4976 = vmatprep.subr.bf16.mxu1 %v5591_v32 }
  0xde   :  { %v6238_v16 = vpop.f32.mrb[1].mxu1 }
  0xdf   :  { %v6240_v24 = vpop.f32.mrb[2].mxu1 }
  0xe0   :  { %v6242_v25 = vpop.f32.mrb[3].mxu1  ;;  %4977 = vmatpush3.bf16.msra.mxu1 %v5591_v32 }
  0xe1   :  { %4978 = vmatprep.subr.bf16.mxu1 %v5593_v34 }
  0xe2   :  { %4911 = vmatmul.mubr.msk.bf16.gmra.mrb[16].mxu0 %vm151_vm1, %v5820_v17  ;;  %4931 = vmatmul.mubr.msk.bf16.gmra.mrb[12].mxu1 %vm151_vm1, %v6038_v1 }
  0xe3   :  { %4914 = vmatprep.mubr.msk.bf16.mxu0 %vm151_vm1, %v6137_v22  ;;  %4934 = vmatprep.mubr.msk.bf16.mxu1 %vm151_vm1, %v6040_v2 }
  0xe4   :  { %4979 = vmatpush3.bf16.msra.mxu1 %v5593_v34 }
  0xe5   :  { %4980 = vmatprep.subr.bf16.mxu1 %v5595_v36 }
  0xe8   :  { %4981 = vmatpush3.bf16.msra.mxu1 %v5595_v36 }
  0xe9   :  { %4982 = vmatprep.subr.bf16.mxu1 %v5597_v38 }
  0xea   :  { %4915 = vmatmul.mubr.msk.bf16.gmra.mrb[20].mxu0 %vm151_vm1, %v4019_v27  ;;  %4935 = vmatmul.mubr.msk.bf16.gmra.mrb[16].mxu1 %vm151_vm1, %v6050_v3  ;;  %v6328_v3 = vld [vmem:[%s6847_s3] ss:$0 sm:$0xff] }
  0xeb   :  { %4938 = vmatprep.mubr.msk.bf16.mxu1 %vm151_vm1, %v6053_v4 }
  0xec   :  { %4983 = vmatpush3.bf16.msra.mxu1 %v5597_v38 }
  0xed   :  { %5526 = vmatprep.subr.msk.bf16.mxu1 %vm2082_vm2, %v5599_v40 }
  0xf0   :  { %4985 = vmatpush3.bf16.msra.mxu1 %v2213_v42 }
  0xf1   :  { %5018 = vmatprep.subr.bf16.mxu1 %v6319_v44 }
  0xf2   :  { %4939 = vmatmul.mubr.msk.bf16.gmra.mrb[20].mxu1 %vm151_vm1, %v5820_v17  ;;  %v5588_v17 = vld [vmem:[%s6845_s4 + $0x4c] sm:$0xff]  }
  0xf3   :  { %4942 = vmatprep.mubr.msk.bf16.mxu1 %vm151_vm1, %v6137_v22  ;;  %4950 = vmatprep.subr.bf16.mxu0 %v5588_v17 }
  0xf4   :  { %4951 = vmatpush3.bf16.msra.mxu0 %v5588_v17 }
  0xf5   :  { %4952 = vmatprep.subr.bf16.mxu0 %v5590_v31 }
  0xf8   :  { %4953 = vmatpush3.bf16.msra.mxu0 %v5590_v31 }
  0xf9   :  { %4954 = vmatprep.subr.bf16.mxu0 %v5592_v33 }
  0xfa   :  { %4943 = vmatmul.mubr.msk.bf16.gmra.mrb[24].mxu1 %vm151_vm1, %v4019_v27 }
  0xfc   :  { %4955 = vmatpush3.bf16.msra.mxu0 %v5592_v33 }
  0xfd   :  { %4956 = vmatprep.subr.bf16.mxu0 %v5594_v35 }
 0x100   :  { %4957 = vmatpush3.bf16.msra.mxu0 %v5594_v35 }
 0x101   :  { %4958 = vmatprep.subr.bf16.mxu0 %v5596_v37 }
 0x104   :  { %4959 = vmatpush3.bf16.msra.mxu0 %v5596_v37 }
 0x105   :  { %5525 = vmatprep.subr.msk.bf16.mxu0 %vm2082_vm2, %v5598_v39 }
 0x108   :  { %4961 = vmatpush3.bf16.msra.mxu0 %v2084_v41 }
 0x109   :  { %4994 = vmatprep.subr.bf16.mxu0 %v6314_v43 }
 0x195   :  { %v4896_v45 = vpop.f32.mrb[0].mxu0 }
 0x196   :  { %v1564_v46 = vpop.f32.mrb[1].mxu0 }
 0x197   :  { %v4897_v47 = vpop.f32.mrb[2].mxu0 }
 0x198   :  { %v1567_v48 = vpop.f32.mrb[3].mxu0 }
 0x19d   :  { %v4900_v49 = vpop.f32.mrb[4].mxu0 }
 0x19e   :  { %v1580_v50 = vpop.f32.mrb[5].mxu0 }
 0x19f   :  { %v4901_v51 = vpop.f32.mrb[6].mxu0 }
 0x1a0   :  { %v1583_v52 = vpop.f32.mrb[7].mxu0 }
 0x1a5   :  { %v4904_v53 = vpop.f32.mrb[8].mxu0  ;;  %v4924_v54 = vpop.f32.mrb[4].mxu1 }
 0x1a6   :  { %v1857_v55 = vmax.f32 %v4896_v45, %v4924_v54  ;;  %v1596_v56 = vpop.f32.mrb[9].mxu0  ;;  %v1712_v57 = vpop.f32.mrb[5].mxu1 }
 0x1a7   :  { %v1855_v58 = vmax.f32 %v1564_v46, %v1712_v57  ;;  %v4905_v59 = vpop.f32.mrb[10].mxu0  ;;  %v4925_v60 = vpop.f32.mrb[6].mxu1 }
 0x1a8   :  { %v1858_v61 = vmax.f32 %v4897_v47, %v4925_v60  ;;  %v1599_v62 = vpop.f32.mrb[11].mxu0  ;;  %v1715_v63 = vpop.f32.mrb[7].mxu1  ;;  %v1883_v1 = vsel %vm1879_vm3, %v1857_v55, -inf }
 0x1a9   :  { %v1856_v0 = vmax.f32 %v1567_v48, %v1715_v63  ;;  %v1880_v4 = vsel %vm1879_vm3, %v1855_v58, -inf }
 0x1aa   :  { %v1884_v2 = vsel %vm1879_vm3, %v1858_v61, -inf }
 0x1ab   :  { %v1885_v5 = vmax.f32 %v1883_v1, %v1884_v2  ;;  %v1881_v6 = vsel %vm1879_vm3, %v1856_v0, -inf }
 0x1ac   :  { %v1882_v7 = vmax.f32 %v1880_v4, %v1881_v6 }
 0x1ad   :  { %v1924_v8 = vadd.f32 %v6328_v3, %v1885_v5  ;;  %v6333_v9 = vpop.f32.mrb[12].mxu0  ;;  %v4928_v10 = vpop.f32.mrb[8].mxu1 }
 0x1ae   :  { %v1923_v11 = vadd.f32 %v6328_v3, %v1882_v7  ;;  %v1861_v13 = vmax.f32 %v4900_v49, %v4928_v10  ;;  %v6336_v18 = vpop.f32.mrb[13].mxu0  ;;  %v1728_v19 = vpop.f32.mrb[9].mxu1 }
 0x1af   :  { %v1936_v21 = vmax.f32 %v1924_v8, 0.0  ;;  %v1859_v22 = vmax.f32 %v1580_v50, %v1728_v19  ;;  %v6338_v14 = vpop.f32.mrb[14].mxu0  ;;  %v4929_v23 = vpop.f32.mrb[10].mxu1 }
 0x1b0   :  { %v1935_v15 = vmax.f32 %v1923_v11, 0.0  ;;  %v1862_v20 = vmax.f32 %v4901_v51, %v4929_v23  ;;  %v6340_v26 = vpop.f32.mrb[15].mxu0  ;;  %v1731_v27 = vpop.f32.mrb[11].mxu1  ;;  %v1889_v29 = vsel %vm1879_vm3, %v1861_v13, -inf }
 0x1b1   :  { %v1860_v28 = vmax.f32 %v1583_v52, %v1731_v27  ;;  %v1886_v31 = vsel %vm1879_vm3, %v1859_v22, -inf }
 0x1b2   :  { %v1890_v17 = vsel %vm1879_vm3, %v1862_v20, -inf  ;;  %v6344_v30 = vpack.c.bf16 %v1936_v21, %v1935_v15 }
 0x1b3   :  { %v1891_v32 = vmax.f32 %v1889_v29, %v1890_v17  ;;  %v1887_v33 = vsel %vm1879_vm3, %v1860_v28, -inf }
 0x1b4   :  { %v1888_v34 = vmax.f32 %v1886_v31, %v1887_v33 }
 0x1b5   :  { %v1926_v35 = vadd.f32 %v6328_v3, %v1891_v32  ;;  %v6349_v36 = vpop.f32.mrb[16].mxu0  ;;  %v4932_v37 = vpop.f32.mrb[12].mxu1 }
 0x1b6   :  { %v1925_v38 = vadd.f32 %v6328_v3, %v1888_v34  ;;  %v1865_v39 = vmax.f32 %v4904_v53, %v4932_v37  ;;  %v6352_v40 = vpop.f32.mrb[17].mxu0  ;;  %v1744_v41 = vpop.f32.mrb[13].mxu1  ;;  %v5604_v34 = vld [vmem:[%s6845_s4 + $0x10] sm:$0xff]  }
 0x1b7   :  { %v1938_v42 = vmax.f32 %v1926_v35, 0.0  ;;  %v1863_v45 = vmax.f32 %v1596_v56, %v1744_v41  ;;  %v6354_v46 = vpop.f32.mrb[18].mxu0  ;;  %v4933_v47 = vpop.f32.mrb[14].mxu1  ;;  %v5605_v35 = vld [vmem:[%s6846_s5 + $0x10] sm:$0xff]  }
 0x1b8   :  { %v1937_v48 = vmax.f32 %v1925_v38, 0.0  ;;  %v1866_v49 = vmax.f32 %v4905_v59, %v4933_v47  ;;  %v6356_v50 = vpop.f32.mrb[19].mxu0  ;;  %v1747_v51 = vpop.f32.mrb[15].mxu1  ;;  %v1895_v55 = vsel %vm1879_vm3, %v1865_v39, -inf }
 0x1b9   :  { %v1864_v52 = vmax.f32 %v1599_v62, %v1747_v51  ;;  %v1892_v58 = vsel %vm1879_vm3, %v1863_v45, -inf }
 0x1ba   :  { %v6358_v54 = vpack.c.bf16 %v1938_v42, %v1937_v48  ;;  %v1896_v53 = vsel %vm1879_vm3, %v1866_v49, -inf  ;;  %v4366_v57 = vpack.c.bf16 %v1937_v48, %v1936_v21 }
 0x1bb   :  { %v1897_v60 = vmax.f32 %v1895_v55, %v1896_v53  ;;  %v1893_v56 = vsel %vm1879_vm3, %v1864_v52, -inf }
 0x1bc   :  { %v1894_v61 = vmax.f32 %v1892_v58, %v1893_v56  ;;  %4962 = vmatprep.mubr.msk.bf16.mxu0 %vm1879_vm3, %v4366_v57  ;;  %4986 = vmatprep.mubr.msk.bf16.mxu1 %vm1879_vm3, %v4366_v57  ;;  %v5608_v56 = vld [vmem:[%s6845_s4 + $0x20] sm:$0xff]  }
 0x1bd   :  { %v1928_v59 = vadd.f32 %v6328_v3, %v1897_v60  ;;  %v4916_v62 = vpop.f32.mrb[20].mxu0  ;;  %v4936_v63 = vpop.f32.mrb[16].mxu1 }
 0x1be   :  { %v1927_v0 = vadd.f32 %v6328_v3, %v1894_v61  ;;  %v6369_v1 = vadd.f32 %v4916_v62, %v6236_v12  ;;  %v1869_v2 = vmax.f32 %v6333_v9, %v4936_v63  ;;  %v1644_v4 = vpop.f32.mrb[21].mxu0  ;;  %v1760_v5 = vpop.f32.mrb[17].mxu1  ;;  %v5609_v61 = vld [vmem:[%s6846_s5 + $0x20] sm:$0xff]  }
 0x1bf   :  { %v1940_v6 = vmax.f32 %v1928_v59, 0.0  ;;  %v6373_v7 = vadd.f32 %v1644_v4, %v6238_v16  ;;  %v1867_v8 = vmax.f32 %v6336_v18, %v1760_v5  ;;  %v4917_v10 = vpop.f32.mrb[22].mxu0  ;;  %v4937_v11 = vpop.f32.mrb[18].mxu1  ;;  %v5610_v5 = vld [vmem:[%s6845_s4 + $0x28] sm:$0xff]  }
 0x1c0   :  { %v1939_v13 = vmax.f32 %v1927_v0, 0.0  ;;  %v6377_v19 = vadd.f32 %v4917_v10, %v6240_v24  ;;  %v1870_v21 = vmax.f32 %v6338_v14, %v4937_v11  ;;  %v1647_v12 = vpop.f32.mrb[23].mxu0  ;;  %v1763_v22 = vpop.f32.mrb[19].mxu1  ;;  %v1901_v18 = vsel %vm1879_vm3, %v1869_v2, -inf  ;;  %v5602_v24 = vld [vmem:[%s6845_s4 + $0x8] sm:$0xff]  }
 0x1c1   :  { %v6381_v9 = vadd.f32 %v1647_v12, %v6242_v25  ;;  %v1868_v23 = vmax.f32 %v6340_v26, %v1763_v22  ;;  %v5603_v14 = vld [vmem:[%s6846_s5 + $0x8] sm:$0xff]   ;;  %v1898_v25 = vsel %vm1879_vm3, %v1867_v8, -inf }
 0x1c2   :  { %v6384_v15 = vpack.c.bf16 %v1939_v13, %v1938_v42  ;;  %v6386_v16 = vpack.c.bf16 %v1940_v6, %v1939_v13  ;;  %v1902_v20 = vsel %vm1879_vm3, %v1870_v21, -inf  ;;  %v5615_v13 = vld [vmem:[%s6846_s5 + $0x38] ss:$0 sps:$4 sm:$0xff]  }
 0x1c3   :  { %v1903_v27 = vmax.f32 %v1901_v18, %v1902_v20  ;;  %v1899_v26 = vsel %vm1879_vm3, %v1868_v23, -inf  ;;  %v5612_v23 = vld [vmem:[%s6845_s4 + $0x30] sm:$0xff]  }
 0x1c4   :  { %v1900_v28 = vmax.f32 %v1898_v25, %v1899_v26  ;;  %4963 = vmatmul.mubr.msk.bf16.vlgmr.msra.gmra.mrb[24].mxu0 %vm1879_vm3, %v6384_v15  ;;  %4987 = vmatmul.mubr.msk.bf16.vlgmr.msra.gmra.mrb[28].mxu1 %vm1879_vm3, %v6384_v15  ;;  %v5613_v18 = vld [vmem:[%s6846_s5 + $0x30] sm:$0xff]   ;;  %v2457_v26 = vsel %vm2082_vm2, %v5615_v13, 0 }
 0x1c5   :  { %v6403_v29 = vadd.f32 %v6328_v3, %v1903_v27  ;;  %4995 = vmatpush3.bf16.msra.mxu0 %v6314_v43  ;;  %5019 = vmatpush3.bf16.msra.mxu1 %v6319_v44  ;;  %v4940_v17 = vpop.f32.mrb[20].mxu1 }
 0x1c6   :  { %v1929_v31 = vadd.f32 %v6328_v3, %v1900_v28  ;;  %v1873_v32 = vmax.f32 %v6349_v36, %v4940_v17  ;;  %v1776_v33 = vpop.f32.mrb[21].mxu1  ;;  %4996 = vmatprep.subr.bf16.mxu0 %v5602_v24  ;;  %5020 = vmatprep.subr.bf16.mxu1 %v5603_v14  ;;  %v5618_v17 = vld [vmem:[%s6845_s4 + $0x80] sm:$0xff]  }
 0x1c7   :  { %v1942_v43 = vmax.f32 %v6403_v29, 0.0  ;;  %v1871_v44 = vmax.f32 %v6352_v40, %v1776_v33  ;;  %v4941_v37 = vpop.f32.mrb[22].mxu1  ;;  %v5606_v40 = vld [vmem:[%s6845_s4 + $0x18] sm:$0xff]   ;;  %v5621_v33 = vld [vmem:[%s6846_s5 + $0x88] sm:$0xff]  }
 0x1c8   :  { %v1941_v38 = vmax.f32 %v1929_v31, 0.0  ;;  %v1874_v39 = vmax.f32 %v6354_v46, %v4941_v37  ;;  %v1779_v36 = vpop.f32.mrb[23].mxu1  ;;  %v1907_v45 = vsel %vm1879_vm3, %v1873_v32, -inf  ;;  %v5607_v46 = vld [vmem:[%s6846_s5 + $0x18] sm:$0xff]   ;;  %v5619_v31 = vld [vmem:[%s6846_s5 + $0x80] sm:$0xff]   ;;  %v5620_v32 = vld [vmem:[%s6845_s4 + $0x88] sm:$0xff]  }
 0x1c9   :  { %v1872_v41 = vmax.f32 %v6356_v50, %v1779_v36  ;;  %4997 = vmatpush3.bf16.msra.mxu0 %v5602_v24  ;;  %5021 = vmatpush3.bf16.msra.mxu1 %v5603_v14  ;;  %v1904_v49 = vsel %vm1879_vm3, %v1871_v44, -inf  ;;  %v5617_v29 = vld [vmem:[%s6846_s5 + $0x78] sm:$0xff]   ;;  %v5627_v37 = vld [vmem:[%s6846_s5 + $0xa0] sm:$0xff]   ;;  %v5630_v36 = vld [vmem:[%s6845_s4 + $0xb0] ss:$0 sps:$4 sm:$0xff]  }
 0x1ca   :  { %v6419_v42 = vpack.c.bf16 %v1942_v43, %v1941_v38  ;;  %v1908_v47 = vsel %vm1879_vm3, %v1874_v39, -inf  ;;  %4998 = vmatprep.subr.bf16.mxu0 %v5604_v34  ;;  %5022 = vmatprep.subr.bf16.mxu1 %v5605_v35  ;;  %v6423_v48 = vpack.c.bf16 %v1941_v38, %v1940_v6  ;;  %v5611_v6 = vld [vmem:[%s6846_s5 + $0x28] sm:$0xff]   ;;  %v5625_v44 = vld [vmem:[%s6846_s5 + $0x98] sm:$0xff]  }
 0x1cb   :  { %v1909_v50 = vmax.f32 %v1907_v45, %v1908_v47  ;;  %v1905_v51 = vsel %vm1879_vm3, %v1872_v41, -inf  ;;  %v5628_v38 = vld [vmem:[%s6845_s4 + $0xa8] sm:$0xff]   ;;  %v5631_v41 = vld [vmem:[%s6846_s5 + $0xb0] ss:$0 sps:$4 sm:$0xff]   ;;  %v2592_v45 = vsel %vm2082_vm2, %v5630_v36, 0 }
 0x1cc   :  { %v1906_v52 = vmax.f32 %v1904_v49, %v1905_v51  ;;  %4966 = vmatprep.mubr.msk.bf16.mxu0 %vm1879_vm3, %v6423_v48  ;;  %4990 = vmatprep.mubr.msk.bf16.mxu1 %vm1879_vm3, %v6423_v48  ;;  %v5629_v39 = vld [vmem:[%s6846_s5 + $0xa8] sm:$0xff]   ;;  %v2721_v47 = vsel %vm2082_vm2, %v5631_v41, 0  ;;  %v5634_v49 = vld [vmem:[%s6845_s4 + $0xbc] sm:$0xff]  }
 0x1cd   :  { %v1932_v55 = vadd.f32 %v6328_v3, %v1909_v50  ;;  %4999 = vmatpush3.bf16.msra.mxu0 %v5604_v34  ;;  %5023 = vmatpush3.bf16.msra.mxu1 %v5605_v35  ;;  %v4944_v53 = vpop.f32.mrb[24].mxu1  ;;  %v5622_v34 = vld [vmem:[%s6845_s4 + $0x90] sm:$0xff]   ;;  %v5635_v50 = vld [vmem:[%s6846_s5 + $0xbc] sm:$0xff]   ;;  %v5636_v51 = vld [vmem:[%s6845_s4 + $0xc4] sm:$0xff]  }
 0x1ce   :  { %v1931_v57 = vadd.f32 %v6328_v3, %v1906_v52  ;;  %v1877_v58 = vmax.f32 %v6369_v1, %v4944_v53  ;;  %v1792_v60 = vpop.f32.mrb[25].mxu1  ;;  %5000 = vmatprep.subr.bf16.mxu0 %v5606_v40  ;;  %5024 = vmatprep.subr.bf16.mxu1 %v5607_v46  ;;  %v5623_v35 = vld [vmem:[%s6846_s5 + $0x90] sm:$0xff]   ;;  %v5637_v52 = vld [vmem:[%s6846_s5 + $0xc4] sm:$0xff]  }
 0x1cf   :  { %v1944_v59 = vmax.f32 %v1932_v55, 0.0  ;;  %v1875_v62 = vmax.f32 %v6373_v7, %v1792_v60  ;;  %v4945_v63 = vpop.f32.mrb[26].mxu1  ;;  %v5614_v7 = vld [vmem:[%s6845_s4 + $0x38] ss:$0 sps:$4 sm:$0xff]   ;;  %v5638_v55 = vld [vmem:[%s6845_s4 + $0xcc] sm:$0xff]   ;;  %v5643_v60 = vld [vmem:[%s6846_s5 + $0xdc] sm:$0xff]  }
 0x1d0   :  { %v1943_v0 = vmax.f32 %v1931_v57, 0.0  ;;  %v1878_v2 = vmax.f32 %v6377_v19, %v4945_v63  ;;  %v1795_v4 = vpop.f32.mrb[27].mxu1  ;;  %v1913_v8 = vsel %vm1879_vm3, %v1877_v58, -inf  ;;  %v2344_v25 = vsel %vm2082_vm2, %v5614_v7, 0  ;;  %v5639_v53 = vld [vmem:[%s6846_s5 + $0xcc] sm:$0xff]   ;;  %v5640_v57 = vld [vmem:[%s6845_s4 + $0xd4] sm:$0xff]  }
 0x1d1   :  { %v1876_v1 = vmax.f32 %v6381_v9, %v1795_v4  ;;  %5001 = vmatpush3.bf16.msra.mxu0 %v5606_v40  ;;  %5025 = vmatpush3.bf16.msra.mxu1 %v5607_v46  ;;  %v1910_v21 = vsel %vm1879_vm3, %v1875_v62, -inf  ;;  %v5632_v40 = vld [vmem:[%s6845_s4 + $0xb4] sm:$0xff]   ;;  %v5647_v62 = vld [vmem:[%s6846_s5 + $0xec] ss:$0 sps:$4 sm:$0xff]  }
 0x1d2   :  { %v1914_v10 = vsel %vm1879_vm3, %v1878_v2, -inf  ;;  %5002 = vmatprep.subr.bf16.mxu0 %v5608_v56  ;;  %5026 = vmatprep.subr.bf16.mxu1 %v5609_v61  ;;  %v6460_v11 = vpack.c.bf16 %v1943_v0, %v1942_v43  ;;  %v6465_v19 = vpack.c.bf16 %v1944_v59, %v1943_v0  ;;  %v5624_v43 = vld [vmem:[%s6845_s4 + $0x98] sm:$0xff]   ;;  %v3001_v0 = vsel %vm2082_vm2, %v5647_v62, 0  ;;  %v5648_v2 = vld [vmem:[%s6845_s4 + $0xf0] sm:$0xff]  }
 0x1d3   :  { %v1915_v12 = vmax.f32 %v1913_v8, %v1914_v10  ;;  %v1911_v22 = vsel %vm1879_vm3, %v1876_v1, -inf  ;;  %v5633_v46 = vld [vmem:[%s6846_s5 + $0xb4] sm:$0xff]   ;;  %v5655_v8 = vld [vmem:[%s6846_s5 + $0x108] sm:$0xff]  }
 0x1d4   :  { %v1912_v9 = vmax.f32 %v1910_v21, %v1911_v22  ;;  %4967 = vmatmul.mubr.msk.bf16.gmra.mrb[28].mxu0 %vm1879_vm3, %v6460_v11  ;;  %4991 = vmatmul.mubr.msk.bf16.gmra.mrb[32].mxu1 %vm1879_vm3, %v6460_v11  ;;  %v5641_v58 = vld [vmem:[%s6846_s5 + $0xd4] sm:$0xff]   ;;  %v5660_v21 = vld [vmem:[%s6845_s4 + $0x120] sm:$0xff]   ;;  %v5662_v22 = vld [vmem:[%s6845_s4 + $0x128] ss:$0 sps:$4 sm:$0xff]  }
 0x1d5   :  { %v1934_v20 = vadd.f32 %v6328_v3, %v1915_v12  ;;  %5003 = vmatpush3.bf16.msra.mxu0 %v5608_v56  ;;  %5027 = vmatpush3.bf16.msra.mxu1 %v5609_v61  ;;  %v5644_v56 = vld [vmem:[%s6845_s4 + $0xe4] sm:$0xff]   ;;  %v5649_v4 = vld [vmem:[%s6846_s5 + $0xf0] sm:$0xff]   ;;  %v5650_v1 = vld [vmem:[%s6845_s4 + $0xf8] sm:$0xff]  }
 0x1d6   :  { %v1933_v24 = vadd.f32 %v6328_v3, %v1912_v9  ;;  %5010 = vmatprep.mubr.msk.bf16.mxu0 %vm1879_vm3, %v6344_v30  ;;  %5034 = vmatprep.mubr.msk.bf16.mxu1 %vm1879_vm3, %v6344_v30  ;;  %v5616_v30 = vld [vmem:[%s6845_s4 + $0x78] sm:$0xff]   ;;  %v5645_v61 = vld [vmem:[%s6846_s5 + $0xe4] sm:$0xff]   ;;  %v5656_v10 = vld [vmem:[%s6845_s4 + $0x110] sm:$0xff]  }
 0x1d7   :  { %v1946_v14 = vmax.f32 %v1934_v20, 0.0  ;;  %5004 = vmatprep.subr.bf16.mxu0 %v5610_v5  ;;  %5028 = vmatprep.subr.bf16.mxu1 %v5611_v6  ;;  %v5661_v12 = vld [vmem:[%s6846_s5 + $0x120] sm:$0xff]   ;;  %v5663_v9 = vld [vmem:[%s6846_s5 + $0x128] ss:$0 sps:$4 sm:$0xff]   ;;  %v5692_v20 = vmov 0.0  }
 0x1d8   :  { %v1945_v27 = vmax.f32 %v1933_v24, 0.0  ;;  %v5664_v24 = vld [vmem:[%s6848_s7 + $0x28] sm:$0xff]  }
 0x1d9   :  { %5005 = vmatpush3.bf16.msra.mxu0 %v5610_v5  ;;  %5029 = vmatpush3.bf16.msra.mxu1 %v5611_v6  ;;  %v5651_v5 = vld [vmem:[%s6846_s5 + $0xf8] sm:$0xff]   ;;  %v5652_v6 = vld [vmem:[%s6845_s4 + $0x100] sm:$0xff]  }
 0x1da   :  { %5006 = vmatprep.subr.bf16.mxu0 %v5612_v23  ;;  %5030 = vmatprep.subr.bf16.mxu1 %v5613_v18  ;;  %v6487_v28 = vpack.c.bf16 %v1945_v27, %v1944_v59  ;;  %v6489_v3 = vpack.c.bf16 %v1946_v14, %v1945_v27  ;;  %v5646_v59 = vld [vmem:[%s6845_s4 + $0xec] ss:$0 sps:$4 sm:$0xff]   ;;  %v5665_v14 = vld [vmem:[%s6848_s7] sm:$0xff]  }
 0x1db   :  { %v2872_v63 = vsel %vm2082_vm2, %v5646_v59, 0  ;;  %v5667_v27 = vld [vmem:[%s6848_s7 + $0x8] sm:$0xff]  }
 0x1dd   :  { %5007 = vmatpush3.bf16.msra.mxu0 %v5612_v23  ;;  %5031 = vmatpush3.bf16.msra.mxu1 %v5613_v18  ;;  %v3152_v23 = vsel %vm2082_vm2, %v5662_v22, 0  ;;  %v3281_v18 = vsel %vm2082_vm2, %v5663_v9, 0 }
 0x1de   :  { %5527 = vmatprep.subr.msk.bf16.mxu0 %vm2082_vm2, %v5614_v7  ;;  %5528 = vmatprep.subr.msk.bf16.mxu1 %vm2082_vm2, %v5615_v13  ;;  %v5653_v7 = vld [vmem:[%s6846_s5 + $0x100] sm:$0xff]   ;;  %v5659_v13 = vld [vmem:[%s6846_s5 + $0x118] sm:$0xff]  }
 0x1e1   :  { %5009 = vmatpush3.bf16.msra.mxu0 %v2344_v25  ;;  %5033 = vmatpush3.bf16.msra.mxu1 %v2457_v26  ;;  %v5666_v25 = vld [vmem:[%s6848_s7 + $0x30] sm:$0xff]   ;;  %v5670_v26 = vld [vmem:[%s6848_s7 + $0x40] sm:$0xff]  }
 0x1e2   :  { %5042 = vmatprep.subr.bf16.mxu0 %v5616_v30  ;;  %5066 = vmatprep.subr.bf16.mxu1 %v5617_v29 }
 0x1e4   :  { %5011 = vmatmul.mubr.msk.bf16.vlgmr.msra.gmra.mrb[24].mxu0 %vm1879_vm3, %v6358_v54  ;;  %5035 = vmatmul.mubr.msk.bf16.vlgmr.msra.gmra.mrb[28].mxu1 %vm1879_vm3, %v6358_v54 }
 0x1e5   :  { %5014 = vmatprep.mubr.msk.bf16.mxu0 %vm1879_vm3, %v6386_v16  ;;  %5038 = vmatprep.mubr.msk.bf16.mxu1 %vm1879_vm3, %v6386_v16 }
 0x1e6   :  { %5043 = vmatpush3.bf16.msra.mxu0 %v5616_v30  ;;  %5067 = vmatpush3.bf16.msra.mxu1 %v5617_v29  ;;  %v5673_v30 = vld [vmem:[%s6848_s7 + $0x20] sm:$0xff]  }
 0x1e7   :  { %5044 = vmatprep.subr.bf16.mxu0 %v5618_v17  ;;  %5068 = vmatprep.subr.bf16.mxu1 %v5619_v31 }
 0x1ea   :  { %5045 = vmatpush3.bf16.msra.mxu0 %v5618_v17  ;;  %5069 = vmatpush3.bf16.msra.mxu1 %v5619_v31 }
 0x1eb   :  { %5046 = vmatprep.subr.bf16.mxu0 %v5620_v32  ;;  %5070 = vmatprep.subr.bf16.mxu1 %v5621_v33 }
 0x1ec   :  { %5015 = vmatmul.mubr.msk.bf16.gmra.mrb[28].mxu0 %vm1879_vm3, %v6419_v42  ;;  %5039 = vmatmul.mubr.msk.bf16.gmra.mrb[32].mxu1 %vm1879_vm3, %v6419_v42 }
 0x1ed   :  { %5058 = vmatprep.mubr.msk.bf16.mxu0 %vm1879_vm3, %v6358_v54  ;;  %5082 = vmatprep.mubr.msk.bf16.mxu1 %vm1879_vm3, %v6358_v54  ;;  %v5626_v54 = vld [vmem:[%s6845_s4 + $0xa0] sm:$0xff]  }
 0x1ee   :  { %5047 = vmatpush3.bf16.msra.mxu0 %v5620_v32  ;;  %5071 = vmatpush3.bf16.msra.mxu1 %v5621_v33 }
 0x1ef   :  { %5048 = vmatprep.subr.bf16.mxu0 %v5622_v34  ;;  %5072 = vmatprep.subr.bf16.mxu1 %v5623_v35 }
 0x1f2   :  { %5049 = vmatpush3.bf16.msra.mxu0 %v5622_v34  ;;  %5073 = vmatpush3.bf16.msra.mxu1 %v5623_v35 }
 0x1f3   :  { %5050 = vmatprep.subr.bf16.mxu0 %v5624_v43  ;;  %5074 = vmatprep.subr.bf16.mxu1 %v5625_v44 }
 0x1f6   :  { %5051 = vmatpush3.bf16.msra.mxu0 %v5624_v43  ;;  %5075 = vmatpush3.bf16.msra.mxu1 %v5625_v44 }
 0x1f7   :  { %5052 = vmatprep.subr.bf16.mxu0 %v5626_v54  ;;  %5076 = vmatprep.subr.bf16.mxu1 %v5627_v37 }
 0x1fa   :  { %5053 = vmatpush3.bf16.msra.mxu0 %v5626_v54  ;;  %5077 = vmatpush3.bf16.msra.mxu1 %v5627_v37 }
 0x1fb   :  { %5054 = vmatprep.subr.bf16.mxu0 %v5628_v38  ;;  %5078 = vmatprep.subr.bf16.mxu1 %v5629_v39 }
 0x1fe   :  { %5055 = vmatpush3.bf16.msra.mxu0 %v5628_v38  ;;  %5079 = vmatpush3.bf16.msra.mxu1 %v5629_v39 }
 0x1ff   :  { %5529 = vmatprep.subr.msk.bf16.mxu0 %vm2082_vm2, %v5630_v36  ;;  %5530 = vmatprep.subr.msk.bf16.mxu1 %vm2082_vm2, %v5631_v41  ;;  %v4304_v41 = vld [vmem:[%s6849_s6] ss:$0 sm:$0xff] }
 0x202   :  { %5057 = vmatpush3.bf16.msra.mxu0 %v2592_v45  ;;  %5081 = vmatpush3.bf16.msra.mxu1 %v2721_v47 }
 0x203   :  { %5090 = vmatprep.subr.bf16.mxu0 %v5632_v40  ;;  %5114 = vmatprep.subr.bf16.mxu1 %v5633_v46 }
 0x205   :  { %5059 = vmatmul.mubr.msk.bf16.vlgmr.msra.gmra.mrb[24].mxu0 %vm1879_vm3, %v6386_v16  ;;  %5083 = vmatmul.mubr.msk.bf16.vlgmr.msra.gmra.mrb[28].mxu1 %vm1879_vm3, %v6386_v16 }
 0x206   :  { %5062 = vmatprep.mubr.msk.bf16.mxu0 %vm1879_vm3, %v6419_v42  ;;  %5086 = vmatprep.mubr.msk.bf16.mxu1 %vm1879_vm3, %v6419_v42 }
 0x207   :  { %5091 = vmatpush3.bf16.msra.mxu0 %v5632_v40  ;;  %5115 = vmatpush3.bf16.msra.mxu1 %v5633_v46 }
 0x208   :  { %5092 = vmatprep.subr.bf16.mxu0 %v5634_v49  ;;  %5116 = vmatprep.subr.bf16.mxu1 %v5635_v50 }
 0x20b   :  { %5093 = vmatpush3.bf16.msra.mxu0 %v5634_v49  ;;  %5117 = vmatpush3.bf16.msra.mxu1 %v5635_v50 }
 0x20c   :  { %5094 = vmatprep.subr.bf16.mxu0 %v5636_v51  ;;  %5118 = vmatprep.subr.bf16.mxu1 %v5637_v52 }
 0x20d   :  { %5063 = vmatmul.mubr.msk.bf16.gmra.mrb[28].mxu0 %vm1879_vm3, %v6465_v19  ;;  %5087 = vmatmul.mubr.msk.bf16.gmra.mrb[32].mxu1 %vm1879_vm3, %v6465_v19 }
 0x20e   :  { %5106 = vmatprep.mubr.msk.bf16.mxu0 %vm1879_vm3, %v6384_v15  ;;  %5130 = vmatprep.mubr.msk.bf16.mxu1 %vm1879_vm3, %v6384_v15  ;;  %v5642_v15 = vld [vmem:[%s6845_s4 + $0xdc] sm:$0xff]  }
 0x20f   :  { %5095 = vmatpush3.bf16.msra.mxu0 %v5636_v51  ;;  %5119 = vmatpush3.bf16.msra.mxu1 %v5637_v52 }
 0x210   :  { %5096 = vmatprep.subr.bf16.mxu0 %v5638_v55  ;;  %5120 = vmatprep.subr.bf16.mxu1 %v5639_v53 }
 0x213   :  { %5097 = vmatpush3.bf16.msra.mxu0 %v5638_v55  ;;  %5121 = vmatpush3.bf16.msra.mxu1 %v5639_v53 }
 0x214   :  { %5098 = vmatprep.subr.bf16.mxu0 %v5640_v57  ;;  %5122 = vmatprep.subr.bf16.mxu1 %v5641_v58 }
 0x217   :  { %5099 = vmatpush3.bf16.msra.mxu0 %v5640_v57  ;;  %5123 = vmatpush3.bf16.msra.mxu1 %v5641_v58 }
 0x218   :  { %5100 = vmatprep.subr.bf16.mxu0 %v5642_v15  ;;  %5124 = vmatprep.subr.bf16.mxu1 %v5643_v60 }
 0x21b   :  { %5101 = vmatpush3.bf16.msra.mxu0 %v5642_v15  ;;  %5125 = vmatpush3.bf16.msra.mxu1 %v5643_v60 }
 0x21c   :  { %5102 = vmatprep.subr.bf16.mxu0 %v5644_v56  ;;  %5126 = vmatprep.subr.bf16.mxu1 %v5645_v61 }
 0x21f   :  { %5103 = vmatpush3.bf16.msra.mxu0 %v5644_v56  ;;  %5127 = vmatpush3.bf16.msra.mxu1 %v5645_v61 }
 0x220   :  { %5531 = vmatprep.subr.msk.bf16.mxu0 %vm2082_vm2, %v5646_v59  ;;  %5532 = vmatprep.subr.msk.bf16.mxu1 %vm2082_vm2, %v5647_v62 }
 0x223   :  { %5105 = vmatpush3.bf16.msra.mxu0 %v2872_v63  ;;  %5129 = vmatpush3.bf16.msra.mxu1 %v3001_v0  ;;  %v5674_v0 = vld [vmem:[%s6848_s7 + $0x50] sm:$0xff]  }
 0x224   :  { %5138 = vmatprep.subr.bf16.mxu0 %v5648_v2  ;;  %5162 = vmatprep.subr.bf16.mxu1 %v5649_v4 }
 0x226   :  { %5107 = vmatmul.mubr.msk.bf16.vlgmr.msra.gmra.mrb[24].mxu0 %vm1879_vm3, %v6423_v48  ;;  %5131 = vmatmul.mubr.msk.bf16.vlgmr.msra.gmra.mrb[28].mxu1 %vm1879_vm3, %v6423_v48  ;;  %v5654_v48 = vld [vmem:[%s6845_s4 + $0x108] sm:$0xff]  }
 0x227   :  { %5110 = vmatprep.mubr.msk.bf16.mxu0 %vm1879_vm3, %v6460_v11  ;;  %5134 = vmatprep.mubr.msk.bf16.mxu1 %vm1879_vm3, %v6460_v11  ;;  %v5657_v11 = vld [vmem:[%s6846_s5 + $0x110] sm:$0xff]  }
 0x228   :  { %5139 = vmatpush3.bf16.msra.mxu0 %v5648_v2  ;;  %5163 = vmatpush3.bf16.msra.mxu1 %v5649_v4 }
 0x229   :  { %5140 = vmatprep.subr.bf16.mxu0 %v5650_v1  ;;  %5164 = vmatprep.subr.bf16.mxu1 %v5651_v5 }
 0x22c   :  { %5141 = vmatpush3.bf16.msra.mxu0 %v5650_v1  ;;  %5165 = vmatpush3.bf16.msra.mxu1 %v5651_v5  ;;  %v5675_v1 = vld [vmem:[%s6848_s7 + $0x78] sm:$0xff]  }
 0x22d   :  { %5142 = vmatprep.subr.bf16.mxu0 %v5652_v6  ;;  %5166 = vmatprep.subr.bf16.mxu1 %v5653_v7 }
 0x22e   :  { %5111 = vmatmul.mubr.msk.bf16.gmra.mrb[28].mxu0 %vm1879_vm3, %v6487_v28  ;;  %5135 = vmatmul.mubr.msk.bf16.gmra.mrb[32].mxu1 %vm1879_vm3, %v6487_v28  ;;  %v5671_v28 = vld [vmem:[%s6848_s7 + $0x18] sm:$0xff]  }
 0x22f   :  { %5154 = vmatprep.mubr.msk.bf16.mxu0 %vm1879_vm3, %v6386_v16  ;;  %5178 = vmatprep.mubr.msk.bf16.mxu1 %vm1879_vm3, %v6386_v16  ;;  %v5658_v16 = vld [vmem:[%s6845_s4 + $0x118] sm:$0xff]  }
 0x230   :  { %5143 = vmatpush3.bf16.msra.mxu0 %v5652_v6  ;;  %5167 = vmatpush3.bf16.msra.mxu1 %v5653_v7 }
 0x231   :  { %5144 = vmatprep.subr.bf16.mxu0 %v5654_v48  ;;  %5168 = vmatprep.subr.bf16.mxu1 %v5655_v8 }
 0x234   :  { %5145 = vmatpush3.bf16.msra.mxu0 %v5654_v48  ;;  %5169 = vmatpush3.bf16.msra.mxu1 %v5655_v8 }
 0x235   :  { %5146 = vmatprep.subr.bf16.mxu0 %v5656_v10  ;;  %5170 = vmatprep.subr.bf16.mxu1 %v5657_v11 }
 0x238   :  { %5147 = vmatpush3.bf16.msra.mxu0 %v5656_v10  ;;  %5171 = vmatpush3.bf16.msra.mxu1 %v5657_v11 }
 0x239   :  { %5148 = vmatprep.subr.bf16.mxu0 %v5658_v16  ;;  %5172 = vmatprep.subr.bf16.mxu1 %v5659_v13 }
 0x23c   :  { %5149 = vmatpush3.bf16.msra.mxu0 %v5658_v16  ;;  %5173 = vmatpush3.bf16.msra.mxu1 %v5659_v13  ;;  %v5676_v16 = vld [vmem:[%s6848_s7 + $0x58] sm:$0xff]   ;;  %v5677_v13 = vld [vmem:[%s6848_s7 + $0x80] sm:$0xff]  }
 0x23d   :  { %5150 = vmatprep.subr.bf16.mxu0 %v5660_v21  ;;  %5174 = vmatprep.subr.bf16.mxu1 %v5661_v12 }
 0x240   :  { %5151 = vmatpush3.bf16.msra.mxu0 %v5660_v21  ;;  %5175 = vmatpush3.bf16.msra.mxu1 %v5661_v12  ;;  %v5678_v21 = vld [vmem:[%s6848_s7 + $0x60] sm:$0xff]   ;;  %v5679_v12 = vld [vmem:[%s6848_s7 + $0x88] sm:$0xff]  }
 0x241   :  { %5533 = vmatprep.subr.msk.bf16.mxu0 %vm2082_vm2, %v5662_v22  ;;  %5534 = vmatprep.subr.msk.bf16.mxu1 %vm2082_vm2, %v5663_v9  ;;  %v5680_v22 = vld [vmem:[%s6848_s7 + $0x68] sm:$0xff]  }
 0x244   :  { %5153 = vmatpush3.bf16.msra.mxu0 %v3152_v23  ;;  %5177 = vmatpush3.bf16.msra.mxu1 %v3281_v18  ;;  %v5681_v23 = vld [vmem:[%s6848_s7 + $0x90] sm:$0xff]  }
 0x245   :  { %5186 = vmatprep.subr.bf16.mxu0 %v5692_v20  ;;  %5200 = vmatprep.subr.bf16.mxu1 %v5692_v20 }
 0x247   :  { %5155 = vmatmul.mubr.msk.bf16.vlgmr.msra.gmra.mrb[24].mxu0 %vm1879_vm3, %v6419_v42  ;;  %5179 = vmatmul.mubr.msk.bf16.vlgmr.msra.gmra.mrb[28].mxu1 %vm1879_vm3, %v6419_v42  ;;  %v5668_v42 = vld [vmem:[%s6848_s7 + $0x38] sm:$0xff]  }
 0x248   :  { %5158 = vmatprep.mubr.msk.bf16.mxu0 %vm1879_vm3, %v6465_v19  ;;  %5182 = vmatprep.mubr.msk.bf16.mxu1 %vm1879_vm3, %v6465_v19  ;;  %v5669_v19 = vld [vmem:[%s6848_s7 + $0x10] sm:$0xff]  }
 0x249   :  { %5187 = vmatpush3.bf16.msra.mxu0 %v5664_v24  ;;  %5201 = vmatpush3.bf16.msra.mxu1 %v5665_v14  ;;  %v5682_v24 = vld [vmem:[%s6848_s7 + $0x70] sm:$0xff]  }
 0x24a   :  { %5188 = vmatprep.subr.bf16.mxu0 %v5692_v20  ;;  %5202 = vmatprep.subr.bf16.mxu1 %v5692_v20 }
 0x24d   :  { %5189 = vmatpush3.bf16.msra.mxu0 %v5666_v25  ;;  %5203 = vmatpush3.bf16.msra.mxu1 %v5667_v27  ;;  %v5683_v25 = vld [vmem:[%s6848_s7 + $0x98] sm:$0xff]  }
 0x24e   :  { %5190 = vmatprep.subr.bf16.mxu0 %v5692_v20  ;;  %5204 = vmatprep.subr.bf16.mxu1 %v5692_v20 }
 0x24f   :  { %5159 = vmatmul.mubr.msk.bf16.gmra.mrb[28].mxu0 %vm1879_vm3, %v6489_v3  ;;  %5183 = vmatmul.mubr.msk.bf16.gmra.mrb[32].mxu1 %vm1879_vm3, %v6489_v3  ;;  %v5672_v3 = vld [vmem:[%s6848_s7 + $0x48] sm:$0xff]  }
 0x250   :  { %5196 = vmatprep.mubr.msk.bf16.mxu0 %vm5693_vm4, %v5692_v20  ;;  %5210 = vmatprep.mubr.msk.bf16.mxu1 %vm5693_vm4, %v5692_v20 }
 0x251   :  { %5191 = vmatpush3.bf16.msra.mxu0 %v5668_v42  ;;  %5205 = vmatpush3.bf16.msra.mxu1 %v5669_v19 }
 0x252   :  { %5192 = vmatprep.subr.bf16.mxu0 %v5692_v20  ;;  %5206 = vmatprep.subr.bf16.mxu1 %v5692_v20 }
 0x255   :  { %5193 = vmatpush3.bf16.msra.mxu0 %v5670_v26  ;;  %5207 = vmatpush3.bf16.msra.mxu1 %v5671_v28  ;;  %v5684_v26 = vld [vmem:[%s6850_s9] sm:$0xff]   ;;  %v5685_v28 = vld [vmem:[%s6850_s9 + $0x8] sm:$0xff]  }
 0x256   :  { %5194 = vmatprep.subr.bf16.mxu0 %v5692_v20  ;;  %5208 = vmatprep.subr.bf16.mxu1 %v5692_v20 }
 0x259   :  { %5195 = vmatpush3.bf16.msra.mxu0 %v5672_v3  ;;  %5209 = vmatpush3.bf16.msra.mxu1 %v5673_v30  ;;  %v5686_v3 = vld [vmem:[%s6850_s9 + $0x10] sm:$0xff]   ;;  %v5687_v30 = vld [vmem:[%s6850_s9 + $0x18] ss:$0 sps:$4 sm:$0x11]  }
 0x25a   :  { %5214 = vmatprep.subr.bf16.mxu0 %v5692_v20  ;;  %5228 = vmatprep.subr.bf16.mxu1 %v5692_v20 }
 0x31a   :  { %v5156_v29 = vpop.f32.mrb[24].mxu0  ;;  %v5180_v17 = vpop.f32.mrb[28].mxu1 }
 0x31b   :  { %v3366_v31 = vmax.f32 %v5156_v29, %v5180_v17  ;;  %v3188_v32 = vpop.f32.mrb[25].mxu0  ;;  %v3317_v33 = vpop.f32.mrb[29].mxu1  ;;  %v3792_v29 = vsel %vm3790_vm6, %v5687_v30, 0 }
 0x31c   :  { %v3364_v34 = vmax.f32 %v3188_v32, %v3317_v33  ;;  %v5157_v35 = vpop.f32.mrb[26].mxu0  ;;  %v5181_v43 = vpop.f32.mrb[30].mxu1 }
 0x31d   :  { %v3367_v44 = vmax.f32 %v5157_v35, %v5181_v43  ;;  %v3191_v54 = vpop.f32.mrb[27].mxu0  ;;  %v3320_v37 = vpop.f32.mrb[31].mxu1  ;;  %v3376_v39 = vsel %vm3372_vm5, %v3366_v31, -inf }
 0x31e   :  { %v3365_v38 = vmax.f32 %v3191_v54, %v3320_v37  ;;  %v3373_v45 = vsel %vm3372_vm5, %v3364_v34, -inf }
 0x31f   :  { %v3377_v36 = vsel %vm3372_vm5, %v3367_v44, -inf }
 0x320   :  { %v3378_v47 = vmax.f32 %v3376_v39, %v3377_v36  ;;  %v3374_v40 = vsel %vm3372_vm5, %v3365_v38, -inf  ;;  %v4359_v36 = vld [vmem:[%s6851_s8] ss:$0 sm:$0xff] }
 0x321   :  { %v3375_v46 = vmax.f32 %v3373_v45, %v3374_v40 }
 0x322   :  { %v3393_v49 = vadd.f32 %v4304_v41, %v3378_v47  ;;  %v5160_v50 = vpop.f32.mrb[28].mxu0  ;;  %v5184_v51 = vpop.f32.mrb[32].mxu1 }
 0x323   :  { %v3392_v52 = vadd.f32 %v4304_v41, %v3375_v46  ;;  %v3370_v55 = vmax.f32 %v5160_v50, %v5184_v51  ;;  %v3204_v53 = vpop.f32.mrb[29].mxu0  ;;  %v3333_v57 = vpop.f32.mrb[33].mxu1 }
 0x324   :  { %v3397_v58 = vmax.f32 %v3393_v49, 0.0  ;;  %v3368_v15 = vmax.f32 %v3204_v53, %v3333_v57  ;;  %v5161_v60 = vpop.f32.mrb[30].mxu0  ;;  %v5185_v56 = vpop.f32.mrb[34].mxu1 }
 0x325   :  { %v3396_v61 = vmax.f32 %v3392_v52, 0.0  ;;  %v3371_v59 = vmax.f32 %v5161_v60, %v5185_v56  ;;  %v3207_v62 = vpop.f32.mrb[31].mxu0  ;;  %v3336_v63 = vpop.f32.mrb[35].mxu1  ;;  %v3382_v6 = vsel %vm3372_vm5, %v3370_v55, -inf  ;;  %v4360_v55 = vld [vmem:[%s6852_s10] ss:$0 sm:$0xff] }
 0x326   :  { %v3401_v2 = vpack.c.bf16 %v3397_v58, %v3397_v58  ;;  %v3369_v4 = vmax.f32 %v3207_v62, %v3336_v63  ;;  %v3379_v48 = vsel %vm3372_vm5, %v3368_v15, -inf }
 0x327   :  { %v3400_v5 = vpack.c.bf16 %v3396_v61, %v3396_v61  ;;  %v3383_v7 = vsel %vm3372_vm5, %v3371_v59, -inf }
 0x328   :  { %v3384_v8 = vmax.f32 %v3382_v6, %v3383_v7  ;;  %v3380_v10 = vsel %vm3372_vm5, %v3369_v4, -inf  ;;  %5197 = vmatmul.mubr.msk.bf16.vlgmr.msra.gmra.mrb[32].mxu0 %vm3372_vm5, %v3401_v2 }
 0x329   :  { %v3381_v11 = vmax.f32 %v3379_v48, %v3380_v10  ;;  %5215 = vmatpush3.bf16.msra.mxu0 %v5674_v0  ;;  %5211 = vmatmul.mubr.msk.bf16.vlgmr.msra.gmra.mrb[36].mxu1 %vm3372_vm5, %v3400_v5 }
 0x32a   :  { %5229 = vmatpush3.bf16.msra.mxu1 %v5675_v1  ;;  %5216 = vmatprep.subr.bf16.mxu0 %v5692_v20  ;;  %v3395_v18 = vadd.f32 %v4304_v41, %v3384_v8 }
 0x32b   :  { %5230 = vmatprep.subr.bf16.mxu1 %v5692_v20  ;;  %5224 = vmatprep.mubr.msk.bf16.mxu0 %vm5693_vm4, %v5692_v20  ;;  %v3394_v9 = vadd.f32 %v4304_v41, %v3381_v11 }
 0x32c   :  { %5238 = vmatprep.mubr.msk.bf16.mxu1 %vm5693_vm4, %v5692_v20  ;;  %v3399_v27 = vmax.f32 %v3395_v18, 0.0 }
 0x32d   :  { %5217 = vmatpush3.bf16.msra.mxu0 %v5676_v16  ;;  %v3398_v14 = vmax.f32 %v3394_v9, 0.0 }
 0x32e   :  { %5231 = vmatpush3.bf16.msra.mxu1 %v5677_v13  ;;  %5218 = vmatprep.subr.bf16.mxu0 %v5692_v20  ;;  %v3403_v19 = vpack.c.bf16 %v3399_v27, %v3399_v27 }
 0x32f   :  { %5232 = vmatprep.subr.bf16.mxu1 %v5692_v20  ;;  %v3402_v42 = vpack.c.bf16 %v3398_v14, %v3398_v14 }
 0x331   :  { %5219 = vmatpush3.bf16.msra.mxu0 %v5678_v21 }
 0x332   :  { %5233 = vmatpush3.bf16.msra.mxu1 %v5679_v12  ;;  %5220 = vmatprep.subr.bf16.mxu0 %v5692_v20 }
 0x333   :  { %5234 = vmatprep.subr.bf16.mxu1 %v5692_v20 }
 0x335   :  { %5221 = vmatpush3.bf16.msra.mxu0 %v5680_v22 }
 0x336   :  { %5235 = vmatpush3.bf16.msra.mxu1 %v5681_v23  ;;  %5222 = vmatprep.subr.bf16.mxu0 %v5692_v20 }
 0x337   :  { %5236 = vmatprep.subr.bf16.mxu1 %v5692_v20 }
 0x339   :  { %5223 = vmatpush3.bf16.msra.mxu0 %v5682_v24 }
 0x33a   :  { %5237 = vmatpush3.bf16.msra.mxu1 %v5683_v25  ;;  %5242 = vmatprep.subr.bf16.mxu0 %v5692_v20 }
 0x33c   :  { %5225 = vmatmul.mubr.msk.bf16.vlgmr.msra.gmra.mrb[36].mxu0 %vm3372_vm5, %v3402_v42 }
 0x33d   :  { %5239 = vmatmul.mubr.msk.bf16.vlgmr.msra.gmra.mrb[40].mxu1 %vm3372_vm5, %v3403_v19  ;;  %5250 = vmatprep.mubr.msk.bf16.mxu0 %vm5693_vm4, %v5692_v20 }
 0x33e   :  { %5243 = vmatpush3.bf16.msra.mxu0 %v5684_v26 }
 0x33f   :  { %5244 = vmatprep.subr.bf16.mxu0 %v5692_v20 }
 0x342   :  { %5245 = vmatpush3.bf16.msra.mxu0 %v5685_v28 }
 0x343   :  { %5246 = vmatprep.subr.bf16.mxu0 %v5692_v20 }
 0x346   :  { %5247 = vmatpush3.bf16.msra.mxu0 %v5686_v3 }
 0x347   :  { %5248 = vmatprep.subr.bf16.mxu0 %v5692_v20 }
 0x34a   :  { %5249 = vmatpush3.bf16.msra.mxu0 %v3792_v29 }
 0x3fb   :  { %v3492_v17 = vpop.f32.mrb[32].mxu0 }
 0x3fc   :  { %v5198_v31 = vpop.f32.mrb[33].mxu0  ;;  %v3565_v32 = vpop.f32.mrb[36].mxu1 }
 0x3fd   :  { %v3566_v33 = vadd.f32 %v3565_v32, %v3492_v17  ;;  %v3495_v34 = vpop.f32.mrb[34].mxu0  ;;  %v5212_v35 = vpop.f32.mrb[37].mxu1 }
 0x3fe   :  { %v5199_v43 = vpop.f32.mrb[35].mxu0  ;;  %v3568_v44 = vpop.f32.mrb[38].mxu1 }
 0x3ff   :  { %v5213_v54 = vpop.f32.mrb[39].mxu1 }
 0x40f   :  { %v3649_v37 = vpop.f32.mrb[36].mxu0 }
 0x410   :  { %v3655_v38 = vadd.f32 %v3649_v37, %v3566_v33  ;;  %v5226_v39 = vpop.f32.mrb[37].mxu0  ;;  %v3734_v20 = vpop.f32.mrb[40].mxu1 }
 0x411   :  { %v3652_v41 = vpop.f32.mrb[38].mxu0  ;;  %v5240_v45 = vpop.f32.mrb[41].mxu1 }
 0x412   :  { %v3740_v47 = vadd.f32 %v3734_v20, %v3655_v38  ;;  %v5227_v40 = vpop.f32.mrb[39].mxu0  ;;  %v3737_v46 = vpop.f32.mrb[42].mxu1 }
 0x413   :  { %v5241_v49 = vpop.f32.mrb[43].mxu1 }
 0x414   :  { %v3748_v50 = vadd.f32 %v4359_v36, %v3740_v47 }
 0x416   :  { %v3749_v51 = vmax.f32 %v3748_v50, 0.0 }
 0x418   :  { %v3750_v52 = vpack.c.bf16 %v3749_v51, %v3749_v51 }
 0x41a   :  { %5251 = vmatmul.mubr.msk.bf16.vlgmr.msra.gmra.mrb[40].mxu0 %vm3786_vm7, %v3750_v52 }
 0x4ed   :  { %v3828_v53 = vpop.f32.mrb[40].mxu0 }
 0x4ee   :  { %v3829_v57 = vadd.f32 %v4360_v55, %v3828_v53  ;;  %v5252_v58 = vpop.f32.mrb[41].mxu0 }
 0x4ef   :  { %v3831_v15 = vpop.f32.mrb[42].mxu0 }
 0x4f0   :  { %v5253_v60 = vpop.f32.mrb[43].mxu0  ;;  %v3835_v56 = vsel %vm3834_vm8, %v3829_v57, -inf }
 0x4f1   :  { %3836 = vmax.xlane.f32.xlu0 %v3835_v56 }
 0x57e   :  { %v3837_v61 = vpop.xlane.xlu0 %3836 }
 0x57f   :  { %v3838_v59 = vsub.f32 %v3829_v57, %v3837_v61 }
 0x581   :  { %v3839_v62 = vmul.f32 1.442695, %v3838_v59 }
 0x583   :  { %5688 = vpow2.f32 %v3839_v62 }
 0x58d   :  { %v5689_v63 = vpop.eup %5688 }
 0x58e   :  { %v3841_v0 = vsel %vm3834_vm8, %v5689_v63, 0.0 }
 0x58f   :  { %3842 = vadd.xlane.f32.xlu0 %v3841_v0 }
 0x61c   :  { %v3843_v2 = vpop.xlane.xlu0 %3842 }
 0x61d   :  { %5690 = vlog2.f32 %v3843_v2 }
 0x627   :  { %v5691_v4 = vpop.eup %5690 }
 0x628   :  { %v3845_v1 = vmul.f32 0.6931472, %v5691_v4 }
 0x62a   :  { %v3846_v5 = vadd.f32 %v3845_v1, %v3837_v61 }
 0x62c   :  { %v3847_v6 = vsub.f32 %v3829_v57, %v3846_v5 }
 0x62e   :  { %3848 = vst.msk [vmem:[%s6853_s11] sm:$0xff] %vm3834_vm8, %v3847_v6 }

</bundles_post_ra>
